<compile_context>
chip_gen: v5e
topology: v5e:2x2
jax: 0.10.0
libtpu: 0.0.40
codegen_flags: <defaults>
</compile_context>

<pallas_src>
import jax
import jax.numpy as jnp
from jax.experimental import pallas as pl
from jax.experimental.pallas import tpu as pltpu

LANE = 128


def _round_up(n, m):
    return ((n + m - 1) // m) * m


# ----------------------------- fused kernel ---------------------------------

def _make_encoder_kernel(K, L, has_ds, pmax_pad, T, Bt, CIN, C, CE):
    """All TemporalBlocks + final Linear for Bt batch rows (grid over B/Bt)."""
    dilations = [2 ** i for i in range(L)]
    M = Bt * T

    def kernel(*refs):
        it = iter(refs)
        x_ref = next(it)
        w1_0 = next(it)
        if has_ds:
            wd_ref = next(it)
            bd_ref = next(it)
        w1r = next(it) if L > 1 else None
        w2_ref = next(it)
        b1_ref = next(it); s1_ref = next(it); t1_ref = next(it)
        b2_ref = next(it); s2_ref = next(it); t2_ref = next(it)
        lw_ref = next(it); lb_ref = next(it)
        out_ref = next(it)
        pad_ref = next(it)

        CP = pad_ref.shape[2]

        # Zero ONLY the causal look-back rows; rows [pmax_pad:] are fully
        # overwritten before every read.  Done every grid step on purpose:
        # with "parallel" megacore sharding each TC owns its own scratch.
        if pmax_pad > 0:
            pad_ref[:, :pmax_pad, :] = jnp.zeros(
                (Bt, pmax_pad, CP), dtype=pad_ref.dtype)

        def causal_conv(h, getw, bias, d, cin):
            # h: (Bt, T, cin) f32.  out[t] = b + sum_k h[t-(K-1-k)*d] @ W_k
            # (zeros for t<0).  K accumulated bf16 MXU dots, f32 accumulation;
            # no (T, K*C) concat temporary.
            hb = h.astype(jnp.bfloat16).reshape(M, cin)
            acc = jnp.dot(hb, getw(K - 1),
                          preferred_element_type=jnp.float32)   # current-time tap
            if K > 1:
                pad_ref[:, pmax_pad:, :cin] = h                  # write history once
                for k in range(K - 1):
                    off = pmax_pad - (K - 1 - k) * d
                    tap = pad_ref[:, off:off + T, :cin]
                    acc = acc + jnp.dot(
                        tap.reshape(M, cin).astype(jnp.bfloat16), getw(k),
                        preferred_element_type=jnp.float32)
            return acc + bias

        h = x_ref[...]                                           # (Bt, T, CIN)
        for i in range(L):
            d = dilations[i]
            cin = CIN if i == 0 else C
            # residual branch on the block *input* (PyTorch order)
            if i == 0 and has_ds:
                res = jnp.dot(h.reshape(M, cin).astype(jnp.bfloat16),
                              wd_ref[...],
                              preferred_element_type=jnp.float32) + bd_ref[...]
            else:
                res = h.reshape(M, cin)
            if i == 0:
                getw1 = lambda k: w1_0[k]
            else:
                getw1 = lambda k, j=i - 1: w1r[j, k]
            a1 = causal_conv(h, getw1, b1_ref[i], d, cin)
            h1 = jnp.maximum(a1, 0.0) * s1_ref[i] + t1_ref[i]    # dropout(BN(relu)) eval
            a2 = causal_conv(h1.reshape(Bt, T, C),
                             lambda k, j=i: w2_ref[j, k], b2_ref[i], d, C)
            h2 = jnp.maximum(a2, 0.0) * s2_ref[i] + t2_ref[i]
            h = jnp.maximum(h2 + res, 0.0).reshape(Bt, T, C)     # block final ReLU
        out = jnp.dot(h.reshape(M, C).astype(jnp.bfloat16), lw_ref[...],
                      preferred_element_type=jnp.float32) + lb_ref[...]
        out_ref[...] = out.reshape(Bt, T, CE)

    return kernel


# ----------------------------- wrapper ---------------------------------------

def _pick_batch_tile(B, T):
    # Enough rows per step to give the MXU a reasonable M dimension while
    # keeping >= 2 grid steps (when B >= 2) so v7x megacore gets both TCs busy.
    cap = max(1, 256 // max(T, 1))
    if B >= 2:
        cap = min(cap, max(1, B // 2))
    bt = 1
    for cand in range(1, min(cap, B) + 1):
        if B % cand == 0:
            bt = cand
    return bt


def encoder_tcn_forward(x, packed, bt=None):
    """x: (B, T, input_dim) f32  ->  (B, T, embedding_dim) f32."""
    B, T, cin = x.shape
    CIN, C, CE = packed["CIN"], packed["C"], packed["CE"]
    K, L, E = packed["K"], packed["L"], packed["E"]
    has_ds = packed["has_downsample"]

    pmax = (K - 1) * (2 ** (L - 1))
    pmax_pad = _round_up(pmax, 8)          # sublane-aligned history store
    CP = max(CIN, C)
    if bt is None:
        bt = _pick_batch_tile(B, T)
    assert B % bt == 0

    # lane-dense input, padded only to round_up(input_dim, 128)
    xp = jnp.zeros((B, T, CIN), jnp.float32).at[:, :, :cin].set(
        x.astype(jnp.float32))

    inputs = [xp, packed["W1_0"]]
    if has_ds:
        inputs += [packed["WD"], packed["BD"]]
    if L > 1:
        inputs += [packed["W1R"]]
    inputs += [packed["W2"], packed["B1"], packed["S1"], packed["T1"],
               packed["B2"], packed["S2"], packed["T2"],
               packed["LW"], packed["LB"]]

    def _resident(a):                      # whole array, VMEM-resident each step
        nd = a.ndim
        return pl.BlockSpec(a.shape, lambda b, _nd=nd: (0,) * _nd)

    in_specs = [pl.BlockSpec((bt, T, CIN), lambda b: (b, 0, 0))]
    in_specs += [_resident(a) for a in inputs[1:]]

    # Explicit VMEM budget (pipeline double-buffers every input) -> raise the
    # scoped limit above v5e's 16 MiB default, stay under v7x's 64 MiB per-TC.
    resident_bytes = 2 * sum(int(a.size) * a.dtype.itemsize for a in inputs[1:])
    stream_bytes = 2 * (bt * T * CIN * 4 + bt * T * CE * 4)
    scratch_bytes = bt * (pmax_pad + T) * CP * 4
    vmem_limit = int(min(64 << 20,
                         max(32 << 20,
                             2 * (resident_bytes + stream_bytes + scratch_bytes))))

    MT = B * T
    flops = 2 * MT * (K * CIN * C + K * C * C * (2 * L - 1)
                      + (CIN * C if has_ds else 0) + C * CE)
    bytes_accessed = (sum(int(a.size) * a.dtype.itemsize for a in inputs)
                      + B * T * CE * 4)

    out_p = pl.pallas_call(
        _make_encoder_kernel(K, L, has_ds, pmax_pad, T, bt, CIN, C, CE),
        out_shape=jax.ShapeDtypeStruct((B, T, CE), jnp.float32),
        grid=(B // bt,),
        in_specs=in_specs,
        out_specs=pl.BlockSpec((bt, T, CE), lambda b: (b, 0, 0)),
        scratch_shapes=[pltpu.VMEM((bt, pmax_pad + T, CP), jnp.float32)],
        compiler_params=pltpu.CompilerParams(
            dimension_semantics=("parallel",),     # shard batch over v7x's 2 TCs
            vmem_limit_bytes=vmem_limit),
        cost_estimate=pl.CostEstimate(flops=int(flops), transcendentals=0,
                                      bytes_accessed=int(bytes_accessed)),
    )(*inputs)
    return out_p[:, :, :E]


# ----------------------------- parameter init / packing ---------------------

def init_params(key, input_dim, embedding_dim, hidden_dim, num_layers, kernel_size):
    eps = 1e-5

    def folded_weight_norm(kv, kg, cout, cin, K):
        # weight_norm: w = g * v / ||v||, norm per output channel (dim=0)
        v = 0.01 * jax.random.normal(kv, (cout, cin, K), jnp.float32)
        g = 1.0 + 0.1 * jax.random.normal(kg, (cout, 1, 1), jnp.float32)
        nrm = jnp.sqrt(jnp.sum(v * v, axis=(1, 2), keepdims=True)) + 1e-12
        return g * v / nrm                                   # torch layout (cout, cin, K)

    blocks = []
    for i in range(num_layers):
        cin = input_dim if i == 0 else hidden_dim
        cout = hidden_dim
        key, *ks = jax.random.split(key, 15)

        w1_t = folded_weight_norm(ks[0], ks[1], cout, cin, kernel_size)
        w2_t = folded_weight_norm(ks[2], ks[3], cout, cout, kernel_size)
        b1 = 0.05 * jax.random.normal(ks[4], (1, cout), jnp.float32)
        b2 = 0.05 * jax.random.normal(ks[5], (1, cout), jnp.float32)

        # BatchNorm (eval, running_mean=0, running_var=1): y = relu(x)*scale + shift
        g1 = 1.0 + 0.1 * jax.random.normal(ks[6], (1, cout), jnp.float32)
        be1 = 0.1 * jax.random.normal(ks[7], (1, cout), jnp.float32)
        g2 = 1.0 + 0.1 * jax.random.normal(ks[8], (1, cout), jnp.float32)
        be2 = 0.1 * jax.random.normal(ks[9], (1, cout), jnp.float32)
        s1, t1 = g1 / jnp.sqrt(1.0 + eps), be1
        s2, t2 = g2 / jnp.sqrt(1.0 + eps), be2

        if cin != cout:
            wd_t = 0.01 * jax.random.normal(ks[10], (cout, cin, 1), jnp.float32)
            wd = jnp.transpose(wd_t[:, :, 0], (1, 0))        # (cin, cout)
            bd = 0.05 * jax.random.normal(ks[11], (1, cout), jnp.float32)
        else:
            wd, bd = None, None

        blocks.append(dict(
            w1=jnp.transpose(w1_t, (2, 1, 0)),               # (K, cin, cout)
            b1=b1, s1=s1, t1=t1,
            w2=jnp.transpose(w2_t, (2, 1, 0)),               # (K, cout, cout)
            b2=b2, s2=s2, t2=t2,
            wd=wd, bd=bd,
        ))

    key, k1, k2 = jax.random.split(key, 3)
    lin_w_t = 0.1 * jax.random.normal(k1, (embedding_dim, hidden_dim), jnp.float32)
    lin_b = 0.05 * jax.random.normal(k2, (1, embedding_dim), jnp.float32)
    return dict(blocks=blocks, lin_w=lin_w_t.T, lin_b=lin_b)


def pack_params(params, lane=LANE):
    """Pad channel dims to lane multiples; conv/linear weights stored as bf16."""
    blocks = params["blocks"]
    L = len(blocks)
    K = blocks[0]["w1"].shape[0]
    cin0 = blocks[0]["w1"].shape[1]
    H, E = params["lin_w"].shape
    CIN = _round_up(cin0, lane)
    C = _round_up(H, lane)
    CE = _round_up(E, lane)

    # Encoder_TCN only ever creates a downsample on the first block.
    for bp in blocks[1:]:
        assert bp["wd"] is None

    def pad_mat(a, rows, cols, dtype):
        out = jnp.zeros((rows, cols), jnp.float32)
        out = out.at[:a.shape[0], :a.shape[1]].set(a)
        return out.astype(dtype)

    def pad_row(a, cols, fill=0.0):
        return jnp.full((1, cols), fill, jnp.float32).at[:, :a.shape[1]].set(a)

    def pack_conv(w, rows):                # (K, cin, cout) -> (K, rows, C) bf16
        return jnp.stack([pad_mat(w[k], rows, C, jnp.bfloat16) for k in range(K)])

    W1_0 = pack_conv(blocks[0]["w1"], CIN)                       # (K, CIN, C)
    W1R = (jnp.stack([pack_conv(bp["w1"], C) for bp in blocks[1:]])
           if L > 1 else None)                                   # (L-1, K, C, C)
    W2 = jnp.stack([pack_conv(bp["w2"], C) for bp in blocks])    # (L, K, C, C)

    B1 = jnp.stack([pad_row(bp["b1"], C) for bp in blocks])      # (L, 1, C) f32
    S1 = jnp.stack([pad_row(bp["s1"], C, 1.0) for bp in blocks])
    T1 = jnp.stack([pad_row(bp["t1"], C) for bp in blocks])
    B2 = jnp.stack([pad_row(bp["b2"], C) for bp in blocks])
    S2 = jnp.stack([pad_row(bp["s2"], C, 1.0) for bp in blocks])
    T2 = jnp.stack([pad_row(bp["t2"], C) for bp in blocks])

    has_ds = blocks[0]["wd"] is not None
    WD = pad_mat(blocks[0]["wd"], CIN, C, jnp.bfloat16) if has_ds else None
    BD = pad_row(blocks[0]["bd"], C) if has_ds else None
    LW = pad_mat(params["lin_w"], C, CE, jnp.bfloat16)
    LB = pad_row(params["lin_b"], CE)

    return dict(W1_0=W1_0, W1R=W1R, W2=W2, B1=B1, S1=S1, T1=T1,
                B2=B2, S2=S2, T2=T2, WD=WD, BD=BD, LW=LW, LB=LB,
                CIN=CIN, C=C, CE=CE, K=K, L=L, E=E, has_downsample=has_ds)


# ----------------------------- pure-JAX reference ----------------------------

def _reference_forward(x, params):
    hi = jax.lax.Precision.HIGHEST
    K = params["blocks"][0]["w1"].shape[0]
    h = x
    for i, bp in enumerate(params["blocks"]):
        d = 2 ** i
        P = (K - 1) * d
        if bp["wd"] is not None:
            res = jnp.einsum("btc,ch->bth", h, bp["wd"], precision=hi) + bp["bd"]
        else:
            res = h

        def conv(hin, w, b):
            hp = jnp.pad(hin, ((0, 0), (P, 0), (0, 0)))
            Tn = hin.shape[1]
            out = b
            for k in range(K):
                out = out + jnp.einsum("btc,ch->bth",
                                       hp[:, k * d:k * d + Tn, :], w[k], precision=hi)
            return out

        a1 = conv(h, bp["w1"], bp["b1"])
        h1 = jnp.maximum(a1, 0.0) * bp["s1"] + bp["t1"]
        a2 = conv(h1, bp["w2"], bp["b2"])
        h2 = jnp.maximum(a2, 0.0) * bp["s2"] + bp["t2"]
        h = jnp.maximum(h2 + res, 0.0)
    return jnp.einsum("btc,ce->bte", h, params["lin_w"], precision=hi) + params["lin_b"]


# ----------------------------- main ------------------------------------------

if __name__ == "__main__":
    B, T = 2, 16
    input_dim, embedding_dim, hidden_dim = 4, 8, 32
    num_layers, kernel_size = 2, 3

    key = jax.random.PRNGKey(0)
    kx, kp = jax.random.split(key)
    x = jax.random.normal(kx, (B, T, input_dim), jnp.float32)
    params = init_params(kp, input_dim, embedding_dim, hidden_dim,
                         num_layers, kernel_size)
    packed = pack_params(params)

    out = jax.block_until_ready(encoder_tcn_forward(x, packed))
    assert out.shape == (B, T, embedding_dim), out.shape
    assert bool(jnp.all(jnp.isfinite(out)))

    # f32 reference; kernel runs bf16 MXU matmuls with f32 accumulation.
    ref = jax.block_until_ready(_reference_forward(x, params))
    assert jnp.allclose(out, ref, rtol=5e-2, atol=5e-2), \
        float(jnp.max(jnp.abs(out - ref)))

    print("KERNEL_OK")
</pallas_src>

<mosaic_0001>
module attributes {stable_mosaic.version = 11 : i64} {
  func.func @kernel(%arg0: i32, %arg1: memref<1x16x128xf32, #tpu.memory_space<vmem>>, %arg2: memref<3x128x128xbf16, #tpu.memory_space<vmem>>, %arg3: memref<128x128xbf16, #tpu.memory_space<vmem>>, %arg4: memref<1x128xf32, #tpu.memory_space<vmem>>, %arg5: memref<1x3x128x128xbf16, #tpu.memory_space<vmem>>, %arg6: memref<2x3x128x128xbf16, #tpu.memory_space<vmem>>, %arg7: memref<2x1x128xf32, #tpu.memory_space<vmem>>, %arg8: memref<2x1x128xf32, #tpu.memory_space<vmem>>, %arg9: memref<2x1x128xf32, #tpu.memory_space<vmem>>, %arg10: memref<2x1x128xf32, #tpu.memory_space<vmem>>, %arg11: memref<2x1x128xf32, #tpu.memory_space<vmem>>, %arg12: memref<2x1x128xf32, #tpu.memory_space<vmem>>, %arg13: memref<128x128xbf16, #tpu.memory_space<vmem>>, %arg14: memref<1x128xf32, #tpu.memory_space<vmem>>, %arg15: memref<1x16x128xf32, #tpu.memory_space<vmem>>, %arg16: memref<1x24x128xf32, #tpu.memory_space<vmem>>) attributes {dimension_semantics = [#tpu.dimension_semantics<parallel>], iteration_bounds = array<i64: 2>, scalar_prefetch = 0 : i64, scratch_operands = 1 : i64, tpu.core_type = #tpu.core_type<tc>, window_params = [{transform_indices = @transform_0, window_bounds = array<i64: 1, 16, 128>}, {pipeline_mode = #tpu.pipeline_mode<synchronous>, transform_indices = @transform_1, window_bounds = array<i64: 3, 128, 128>}, {pipeline_mode = #tpu.pipeline_mode<synchronous>, transform_indices = @transform_2, window_bounds = array<i64: 128, 128>}, {pipeline_mode = #tpu.pipeline_mode<synchronous>, transform_indices = @transform_3, window_bounds = array<i64: 1, 128>}, {pipeline_mode = #tpu.pipeline_mode<synchronous>, transform_indices = @transform_4, window_bounds = array<i64: 1, 3, 128, 128>}, {pipeline_mode = #tpu.pipeline_mode<synchronous>, transform_indices = @transform_5, window_bounds = array<i64: 2, 3, 128, 128>}, {pipeline_mode = #tpu.pipeline_mode<synchronous>, transform_indices = @transform_6, window_bounds = array<i64: 2, 1, 128>}, {pipeline_mode = #tpu.pipeline_mode<synchronous>, transform_indices = @transform_7, window_bounds = array<i64: 2, 1, 128>}, {pipeline_mode = #tpu.pipeline_mode<synchronous>, transform_indices = @transform_8, window_bounds = array<i64: 2, 1, 128>}, {pipeline_mode = #tpu.pipeline_mode<synchronous>, transform_indices = @transform_9, window_bounds = array<i64: 2, 1, 128>}, {pipeline_mode = #tpu.pipeline_mode<synchronous>, transform_indices = @transform_10, window_bounds = array<i64: 2, 1, 128>}, {pipeline_mode = #tpu.pipeline_mode<synchronous>, transform_indices = @transform_11, window_bounds = array<i64: 2, 1, 128>}, {pipeline_mode = #tpu.pipeline_mode<synchronous>, transform_indices = @transform_12, window_bounds = array<i64: 128, 128>}, {pipeline_mode = #tpu.pipeline_mode<synchronous>, transform_indices = @transform_13, window_bounds = array<i64: 1, 128>}, {transform_indices = @transform_14, window_bounds = array<i64: 1, 16, 128>}]} {
    %cst = arith.constant 0.000000e+00 : f32
    %0 = vector.broadcast %cst : f32 to vector<1x8x128xf32>
    %c0 = arith.constant 0 : index
    %c0_0 = arith.constant 0 : index
    %c0_1 = arith.constant 0 : index
    %1 = vector.load %arg16[%c0, %c0_0, %c0_1] : memref<1x24x128xf32, #tpu.memory_space<vmem>>, vector<1x8x128xf32>
    tpu.vector_store %arg16[%c0, %c0_0, %c0_1], %0 {strides = array<i32>} : memref<1x24x128xf32, #tpu.memory_space<vmem>>, vector<1x8x128xf32>,
    %c0_2 = arith.constant 0 : index
    %c0_3 = arith.constant 0 : index
    %c0_4 = arith.constant 0 : index
    %2 = vector.load %arg1[%c0_2, %c0_3, %c0_4] : memref<1x16x128xf32, #tpu.memory_space<vmem>>, vector<1x16x128xf32>
    %3 = vector.shape_cast %2 : vector<1x16x128xf32> to vector<16x128xf32>
    %4 = arith.truncf %3 : vector<16x128xf32> to vector<16x128xbf16>
    %c0_5 = arith.constant 0 : index
    %c0_6 = arith.constant 0 : index
    %5 = vector.load %arg3[%c0_5, %c0_6] : memref<128x128xbf16, #tpu.memory_space<vmem>>, vector<128x128xbf16>
    %cst_7 = arith.constant dense<0.000000e+00> : vector<16x128xf32>
    %6 = tpu.matmul %4, %5, %cst_7 {dimension_numbers = #tpu.dot_dimension_numbers<[1], [0], [0], [1], [0, 0, 1, 1], [], []>} : vector<16x128xbf16>, vector<128x128xbf16>, vector<16x128xf32> -> vector<16x128xf32>
    %c0_8 = arith.constant 0 : index
    %c0_9 = arith.constant 0 : index
    %7 = vector.load %arg4[%c0_8, %c0_9] : memref<1x128xf32, #tpu.memory_space<vmem>>, vector<1x128xf32>
    %8 = vector.broadcast %7 : vector<1x128xf32> to vector<16x128xf32>
    %9 = arith.addf %6, %8 : vector<16x128xf32>
    %c0_10 = arith.constant 0 : index
    %c0_11 = arith.constant 0 : index
    %c0_12 = arith.constant 0 : index
    %10 = vector.load %arg7[%c0_10, %c0_11, %c0_12] : memref<2x1x128xf32, #tpu.memory_space<vmem>>, vector<1x1x128xf32>
    %11 = vector.shape_cast %10 : vector<1x1x128xf32> to vector<1x128xf32>
    %12 = arith.truncf %2 : vector<1x16x128xf32> to vector<1x16x128xbf16>
    %13 = vector.shape_cast %12 : vector<1x16x128xbf16> to vector<16x128xbf16>
    %c2 = arith.constant 2 : index
    %c0_13 = arith.constant 0 : index
    %c0_14 = arith.constant 0 : index
    %14 = vector.load %arg2[%c2, %c0_13, %c0_14] : memref<3x128x128xbf16, #tpu.memory_space<vmem>>, vector<1x128x128xbf16>
    %15 = vector.shape_cast %14 : vector<1x128x128xbf16> to vector<128x128xbf16>
    %cst_15 = arith.constant dense<0.000000e+00> : vector<16x128xf32>
    %16 = tpu.matmul %13, %15, %cst_15 {dimension_numbers = #tpu.dot_dimension_numbers<[1], [0], [0], [1], [0, 0, 1, 1], [], []>} : vector<16x128xbf16>, vector<128x128xbf16>, vector<16x128xf32> -> vector<16x128xf32>
    %c0_16 = arith.constant 0 : index
    %c8 = arith.constant 8 : index
    %c0_17 = arith.constant 0 : index
    %17 = vector.load %arg16[%c0_16, %c8, %c0_17] : memref<1x24x128xf32, #tpu.memory_space<vmem>>, vector<1x16x128xf32>
    tpu.vector_store %arg16[%c0_16, %c8, %c0_17], %2 {strides = array<i32>} : memref<1x24x128xf32, #tpu.memory_space<vmem>>, vector<1x16x128xf32>,
    %c0_18 = arith.constant 0 : index
    %c6 = arith.constant 6 : index
    %c0_19 = arith.constant 0 : index
    %18 = vector.load %arg16[%c0_18, %c6, %c0_19] : memref<1x24x128xf32, #tpu.memory_space<vmem>>, vector<1x16x128xf32>
    %19 = vector.shape_cast %18 : vector<1x16x128xf32> to vector<16x128xf32>
    %20 = arith.truncf %19 : vector<16x128xf32> to vector<16x128xbf16>
    %c0_20 = arith.constant 0 : index
    %c0_21 = arith.constant 0 : index
    %c0_22 = arith.constant 0 : index
    %21 = vector.load %arg2[%c0_20, %c0_21, %c0_22] : memref<3x128x128xbf16, #tpu.memory_space<vmem>>, vector<1x128x128xbf16>
    %22 = vector.shape_cast %21 : vector<1x128x128xbf16> to vector<128x128xbf16>
    %cst_23 = arith.constant dense<0.000000e+00> : vector<16x128xf32>
    %23 = tpu.matmul %20, %22, %cst_23 {dimension_numbers = #tpu.dot_dimension_numbers<[1], [0], [0], [1], [0, 0, 1, 1], [], []>} : vector<16x128xbf16>, vector<128x128xbf16>, vector<16x128xf32> -> vector<16x128xf32>
    %24 = arith.addf %16, %23 : vector<16x128xf32>
    %c0_24 = arith.constant 0 : index
    %c7 = arith.constant 7 : index
    %c0_25 = arith.constant 0 : index
    %25 = vector.load %arg16[%c0_24, %c7, %c0_25] : memref<1x24x128xf32, #tpu.memory_space<vmem>>, vector<1x16x128xf32>
    %26 = vector.shape_cast %25 : vector<1x16x128xf32> to vector<16x128xf32>
    %27 = arith.truncf %26 : vector<16x128xf32> to vector<16x128xbf16>
    %c1 = arith.constant 1 : index
    %c0_26 = arith.constant 0 : index
    %c0_27 = arith.constant 0 : index
    %28 = vector.load %arg2[%c1, %c0_26, %c0_27] : memref<3x128x128xbf16, #tpu.memory_space<vmem>>, vector<1x128x128xbf16>
    %29 = vector.shape_cast %28 : vector<1x128x128xbf16> to vector<128x128xbf16>
    %cst_28 = arith.constant dense<0.000000e+00> : vector<16x128xf32>
    %30 = tpu.matmul %27, %29, %cst_28 {dimension_numbers = #tpu.dot_dimension_numbers<[1], [0], [0], [1], [0, 0, 1, 1], [], []>} : vector<16x128xbf16>, vector<128x128xbf16>, vector<16x128xf32> -> vector<16x128xf32>
    %31 = arith.addf %24, %30 : vector<16x128xf32>
    %32 = vector.broadcast %11 : vector<1x128xf32> to vector<16x128xf32>
    %33 = arith.addf %31, %32 : vector<16x128xf32>
    %cst_29 = arith.constant 0.000000e+00 : f32
    %34 = vector.broadcast %cst_29 : f32 to vector<16x128xf32>
    %35 = arith.maximumf %33, %34 : vector<16x128xf32>
    %c0_30 = arith.constant 0 : index
    %c0_31 = arith.constant 0 : index
    %c0_32 = arith.constant 0 : index
    %36 = vector.load %arg8[%c0_30, %c0_31, %c0_32] : memref<2x1x128xf32, #tpu.memory_space<vmem>>, vector<1x1x128xf32>
    %37 = vector.shape_cast %36 : vector<1x1x128xf32> to vector<1x128xf32>
    %38 = vector.broadcast %37 : vector<1x128xf32> to vector<16x128xf32>
    %39 = arith.mulf %35, %38 : vector<16x128xf32>
    %c0_33 = arith.constant 0 : index
    %c0_34 = arith.constant 0 : index
    %c0_35 = arith.constant 0 : index
    %40 = vector.load %arg9[%c0_33, %c0_34, %c0_35] : memref<2x1x128xf32, #tpu.memory_space<vmem>>, vector<1x1x128xf32>
    %41 = vector.shape_cast %40 : vector<1x1x128xf32> to vector<1x128xf32>
    %42 = vector.broadcast %41 : vector<1x128xf32> to vector<16x128xf32>
    %43 = arith.addf %39, %42 : vector<16x128xf32>
    %44 = vector.shape_cast %43 : vector<16x128xf32> to vector<1x16x128xf32>
    %c0_36 = arith.constant 0 : index
    %c0_37 = arith.constant 0 : index
    %c0_38 = arith.constant 0 : index
    %45 = vector.load %arg10[%c0_36, %c0_37, %c0_38] : memref<2x1x128xf32, #tpu.memory_space<vmem>>, vector<1x1x128xf32>
    %46 = vector.shape_cast %45 : vector<1x1x128xf32> to vector<1x128xf32>
    %47 = arith.truncf %44 : vector<1x16x128xf32> to vector<1x16x128xbf16>
    %48 = vector.shape_cast %47 : vector<1x16x128xbf16> to vector<16x128xbf16>
    %c0_39 = arith.constant 0 : index
    %c2_40 = arith.constant 2 : index
    %c0_41 = arith.constant 0 : index
    %c0_42 = arith.constant 0 : index
    %49 = vector.load %arg6[%c0_39, %c2_40, %c0_41, %c0_42] : memref<2x3x128x128xbf16, #tpu.memory_space<vmem>>, vector<1x1x128x128xbf16>
    %50 = vector.shape_cast %49 : vector<1x1x128x128xbf16> to vector<128x128xbf16>
    %cst_43 = arith.constant dense<0.000000e+00> : vector<16x128xf32>
    %51 = tpu.matmul %48, %50, %cst_43 {dimension_numbers = #tpu.dot_dimension_numbers<[1], [0], [0], [1], [0, 0, 1, 1], [], []>} : vector<16x128xbf16>, vector<128x128xbf16>, vector<16x128xf32> -> vector<16x128xf32>
    %c0_44 = arith.constant 0 : index
    %c8_45 = arith.constant 8 : index
    %c0_46 = arith.constant 0 : index
    %52 = vector.load %arg16[%c0_44, %c8_45, %c0_46] : memref<1x24x128xf32, #tpu.memory_space<vmem>>, vector<1x16x128xf32>
    tpu.vector_store %arg16[%c0_44, %c8_45, %c0_46], %44 {strides = array<i32>} : memref<1x24x128xf32, #tpu.memory_space<vmem>>, vector<1x16x128xf32>,
    %c0_47 = arith.constant 0 : index
    %c6_48 = arith.constant 6 : index
    %c0_49 = arith.constant 0 : index
    %53 = vector.load %arg16[%c0_47, %c6_48, %c0_49] : memref<1x24x128xf32, #tpu.memory_space<vmem>>, vector<1x16x128xf32>
    %54 = vector.shape_cast %53 : vector<1x16x128xf32> to vector<16x128xf32>
    %55 = arith.truncf %54 : vector<16x128xf32> to vector<16x128xbf16>
    %c0_50 = arith.constant 0 : index
    %c0_51 = arith.constant 0 : index
    %c0_52 = arith.constant 0 : index
    %c0_53 = arith.constant 0 : index
    %56 = vector.load %arg6[%c0_50, %c0_51, %c0_52, %c0_53] : memref<2x3x128x128xbf16, #tpu.memory_space<vmem>>, vector<1x1x128x128xbf16>
    %57 = vector.shape_cast %56 : vector<1x1x128x128xbf16> to vector<128x128xbf16>
    %cst_54 = arith.constant dense<0.000000e+00> : vector<16x128xf32>
    %58 = tpu.matmul %55, %57, %cst_54 {dimension_numbers = #tpu.dot_dimension_numbers<[1], [0], [0], [1], [0, 0, 1, 1], [], []>} : vector<16x128xbf16>, vector<128x128xbf16>, vector<16x128xf32> -> vector<16x128xf32>
    %59 = arith.addf %51, %58 : vector<16x128xf32>
    %c0_55 = arith.constant 0 : index
    %c7_56 = arith.constant 7 : index
    %c0_57 = arith.constant 0 : index
    %60 = vector.load %arg16[%c0_55, %c7_56, %c0_57] : memref<1x24x128xf32, #tpu.memory_space<vmem>>, vector<1x16x128xf32>
    %61 = vector.shape_cast %60 : vector<1x16x128xf32> to vector<16x128xf32>
    %62 = arith.truncf %61 : vector<16x128xf32> to vector<16x128xbf16>
    %c0_58 = arith.constant 0 : index
    %c1_59 = arith.constant 1 : index
    %c0_60 = arith.constant 0 : index
    %c0_61 = arith.constant 0 : index
    %63 = vector.load %arg6[%c0_58, %c1_59, %c0_60, %c0_61] : memref<2x3x128x128xbf16, #tpu.memory_space<vmem>>, vector<1x1x128x128xbf16>
    %64 = vector.shape_cast %63 : vector<1x1x128x128xbf16> to vector<128x128xbf16>
    %cst_62 = arith.constant dense<0.000000e+00> : vector<16x128xf32>
    %65 = tpu.matmul %62, %64, %cst_62 {dimension_numbers = #tpu.dot_dimension_numbers<[1], [0], [0], [1], [0, 0, 1, 1], [], []>} : vector<16x128xbf16>, vector<128x128xbf16>, vector<16x128xf32> -> vector<16x128xf32>
    %66 = arith.addf %59, %65 : vector<16x128xf32>
    %67 = vector.broadcast %46 : vector<1x128xf32> to vector<16x128xf32>
    %68 = arith.addf %66, %67 : vector<16x128xf32>
    %cst_63 = arith.constant 0.000000e+00 : f32
    %69 = vector.broadcast %cst_63 : f32 to vector<16x128xf32>
    %70 = arith.maximumf %68, %69 : vector<16x128xf32>
    %c0_64 = arith.constant 0 : index
    %c0_65 = arith.constant 0 : index
    %c0_66 = arith.constant 0 : index
    %71 = vector.load %arg11[%c0_64, %c0_65, %c0_66] : memref<2x1x128xf32, #tpu.memory_space<vmem>>, vector<1x1x128xf32>
    %72 = vector.shape_cast %71 : vector<1x1x128xf32> to vector<1x128xf32>
    %73 = vector.broadcast %72 : vector<1x128xf32> to vector<16x128xf32>
    %74 = arith.mulf %70, %73 : vector<16x128xf32>
    %c0_67 = arith.constant 0 : index
    %c0_68 = arith.constant 0 : index
    %c0_69 = arith.constant 0 : index
    %75 = vector.load %arg12[%c0_67, %c0_68, %c0_69] : memref<2x1x128xf32, #tpu.memory_space<vmem>>, vector<1x1x128xf32>
    %76 = vector.shape_cast %75 : vector<1x1x128xf32> to vector<1x128xf32>
    %77 = vector.broadcast %76 : vector<1x128xf32> to vector<16x128xf32>
    %78 = arith.addf %74, %77 : vector<16x128xf32>
    %79 = arith.addf %78, %9 : vector<16x128xf32>
    %cst_70 = arith.constant 0.000000e+00 : f32
    %80 = vector.broadcast %cst_70 : f32 to vector<16x128xf32>
    %81 = arith.maximumf %79, %80 : vector<16x128xf32>
    %82 = vector.shape_cast %81 : vector<16x128xf32> to vector<1x16x128xf32>
    %83 = vector.shape_cast %82 : vector<1x16x128xf32> to vector<16x128xf32>
    %c1_71 = arith.constant 1 : index
    %c0_72 = arith.constant 0 : index
    %c0_73 = arith.constant 0 : index
    %84 = vector.load %arg7[%c1_71, %c0_72, %c0_73] : memref<2x1x128xf32, #tpu.memory_space<vmem>>, vector<1x1x128xf32>
    %85 = vector.shape_cast %84 : vector<1x1x128xf32> to vector<1x128xf32>
    %86 = arith.truncf %82 : vector<1x16x128xf32> to vector<1x16x128xbf16>
    %87 = vector.shape_cast %86 : vector<1x16x128xbf16> to vector<16x128xbf16>
    %c0_74 = arith.constant 0 : index
    %c2_75 = arith.constant 2 : index
    %c0_76 = arith.constant 0 : index
    %c0_77 = arith.constant 0 : index
    %88 = vector.load %arg5[%c0_74, %c2_75, %c0_76, %c0_77] : memref<1x3x128x128xbf16, #tpu.memory_space<vmem>>, vector<1x1x128x128xbf16>
    %89 = vector.shape_cast %88 : vector<1x1x128x128xbf16> to vector<128x128xbf16>
    %cst_78 = arith.constant dense<0.000000e+00> : vector<16x128xf32>
    %90 = tpu.matmul %87, %89, %cst_78 {dimension_numbers = #tpu.dot_dimension_numbers<[1], [0], [0], [1], [0, 0, 1, 1], [], []>} : vector<16x128xbf16>, vector<128x128xbf16>, vector<16x128xf32> -> vector<16x128xf32>
    %c0_79 = arith.constant 0 : index
    %c8_80 = arith.constant 8 : index
    %c0_81 = arith.constant 0 : index
    %91 = vector.load %arg16[%c0_79, %c8_80, %c0_81] : memref<1x24x128xf32, #tpu.memory_space<vmem>>, vector<1x16x128xf32>
    tpu.vector_store %arg16[%c0_79, %c8_80, %c0_81], %82 {strides = array<i32>} : memref<1x24x128xf32, #tpu.memory_space<vmem>>, vector<1x16x128xf32>,
    %c0_82 = arith.constant 0 : index
    %c4 = arith.constant 4 : index
    %c0_83 = arith.constant 0 : index
    %92 = vector.load %arg16[%c0_82, %c4, %c0_83] : memref<1x24x128xf32, #tpu.memory_space<vmem>>, vector<1x16x128xf32>
    %93 = vector.shape_cast %92 : vector<1x16x128xf32> to vector<16x128xf32>
    %94 = arith.truncf %93 : vector<16x128xf32> to vector<16x128xbf16>
    %c0_84 = arith.constant 0 : index
    %c0_85 = arith.constant 0 : index
    %c0_86 = arith.constant 0 : index
    %c0_87 = arith.constant 0 : index
    %95 = vector.load %arg5[%c0_84, %c0_85, %c0_86, %c0_87] : memref<1x3x128x128xbf16, #tpu.memory_space<vmem>>, vector<1x1x128x128xbf16>
    %96 = vector.shape_cast %95 : vector<1x1x128x128xbf16> to vector<128x128xbf16>
    %cst_88 = arith.constant dense<0.000000e+00> : vector<16x128xf32>
    %97 = tpu.matmul %94, %96, %cst_88 {dimension_numbers = #tpu.dot_dimension_numbers<[1], [0], [0], [1], [0, 0, 1, 1], [], []>} : vector<16x128xbf16>, vector<128x128xbf16>, vector<16x128xf32> -> vector<16x128xf32>
    %98 = arith.addf %90, %97 : vector<16x128xf32>
    %c0_89 = arith.constant 0 : index
    %c6_90 = arith.constant 6 : index
    %c0_91 = arith.constant 0 : index
    %99 = vector.load %arg16[%c0_89, %c6_90, %c0_91] : memref<1x24x128xf32, #tpu.memory_space<vmem>>, vector<1x16x128xf32>
    %100 = vector.shape_cast %99 : vector<1x16x128xf32> to vector<16x128xf32>
    %101 = arith.truncf %100 : vector<16x128xf32> to vector<16x128xbf16>
    %c0_92 = arith.constant 0 : index
    %c1_93 = arith.constant 1 : index
    %c0_94 = arith.constant 0 : index
    %c0_95 = arith.constant 0 : index
    %102 = vector.load %arg5[%c0_92, %c1_93, %c0_94, %c0_95] : memref<1x3x128x128xbf16, #tpu.memory_space<vmem>>, vector<1x1x128x128xbf16>
    %103 = vector.shape_cast %102 : vector<1x1x128x128xbf16> to vector<128x128xbf16>
    %cst_96 = arith.constant dense<0.000000e+00> : vector<16x128xf32>
    %104 = tpu.matmul %101, %103, %cst_96 {dimension_numbers = #tpu.dot_dimension_numbers<[1], [0], [0], [1], [0, 0, 1, 1], [], []>} : vector<16x128xbf16>, vector<128x128xbf16>, vector<16x128xf32> -> vector<16x128xf32>
    %105 = arith.addf %98, %104 : vector<16x128xf32>
    %106 = vector.broadcast %85 : vector<1x128xf32> to vector<16x128xf32>
    %107 = arith.addf %105, %106 : vector<16x128xf32>
    %cst_97 = arith.constant 0.000000e+00 : f32
    %108 = vector.broadcast %cst_97 : f32 to vector<16x128xf32>
    %109 = arith.maximumf %107, %108 : vector<16x128xf32>
    %c1_98 = arith.constant 1 : index
    %c0_99 = arith.constant 0 : index
    %c0_100 = arith.constant 0 : index
    %110 = vector.load %arg8[%c1_98, %c0_99, %c0_100] : memref<2x1x128xf32, #tpu.memory_space<vmem>>, vector<1x1x128xf32>
    %111 = vector.shape_cast %110 : vector<1x1x128xf32> to vector<1x128xf32>
    %112 = vector.broadcast %111 : vector<1x128xf32> to vector<16x128xf32>
    %113 = arith.mulf %109, %112 : vector<16x128xf32>
    %c1_101 = arith.constant 1 : index
    %c0_102 = arith.constant 0 : index
    %c0_103 = arith.constant 0 : index
    %114 = vector.load %arg9[%c1_101, %c0_102, %c0_103] : memref<2x1x128xf32, #tpu.memory_space<vmem>>, vector<1x1x128xf32>
    %115 = vector.shape_cast %114 : vector<1x1x128xf32> to vector<1x128xf32>
    %116 = vector.broadcast %115 : vector<1x128xf32> to vector<16x128xf32>
    %117 = arith.addf %113, %116 : vector<16x128xf32>
    %118 = vector.shape_cast %117 : vector<16x128xf32> to vector<1x16x128xf32>
    %c1_104 = arith.constant 1 : index
    %c0_105 = arith.constant 0 : index
    %c0_106 = arith.constant 0 : index
    %119 = vector.load %arg10[%c1_104, %c0_105, %c0_106] : memref<2x1x128xf32, #tpu.memory_space<vmem>>, vector<1x1x128xf32>
    %120 = vector.shape_cast %119 : vector<1x1x128xf32> to vector<1x128xf32>
    %121 = arith.truncf %118 : vector<1x16x128xf32> to vector<1x16x128xbf16>
    %122 = vector.shape_cast %121 : vector<1x16x128xbf16> to vector<16x128xbf16>
    %c1_107 = arith.constant 1 : index
    %c2_108 = arith.constant 2 : index
    %c0_109 = arith.constant 0 : index
    %c0_110 = arith.constant 0 : index
    %123 = vector.load %arg6[%c1_107, %c2_108, %c0_109, %c0_110] : memref<2x3x128x128xbf16, #tpu.memory_space<vmem>>, vector<1x1x128x128xbf16>
    %124 = vector.shape_cast %123 : vector<1x1x128x128xbf16> to vector<128x128xbf16>
    %cst_111 = arith.constant dense<0.000000e+00> : vector<16x128xf32>
    %125 = tpu.matmul %122, %124, %cst_111 {dimension_numbers = #tpu.dot_dimension_numbers<[1], [0], [0], [1], [0, 0, 1, 1], [], []>} : vector<16x128xbf16>, vector<128x128xbf16>, vector<16x128xf32> -> vector<16x128xf32>
    %c0_112 = arith.constant 0 : index
    %c8_113 = arith.constant 8 : index
    %c0_114 = arith.constant 0 : index
    %126 = vector.load %arg16[%c0_112, %c8_113, %c0_114] : memref<1x24x128xf32, #tpu.memory_space<vmem>>, vector<1x16x128xf32>
    tpu.vector_store %arg16[%c0_112, %c8_113, %c0_114], %118 {strides = array<i32>} : memref<1x24x128xf32, #tpu.memory_space<vmem>>, vector<1x16x128xf32>,
    %c0_115 = arith.constant 0 : index
    %c4_116 = arith.constant 4 : index
    %c0_117 = arith.constant 0 : index
    %127 = vector.load %arg16[%c0_115, %c4_116, %c0_117] : memref<1x24x128xf32, #tpu.memory_space<vmem>>, vector<1x16x128xf32>
    %128 = vector.shape_cast %127 : vector<1x16x128xf32> to vector<16x128xf32>
    %129 = arith.truncf %128 : vector<16x128xf32> to vector<16x128xbf16>
    %c1_118 = arith.constant 1 : index
    %c0_119 = arith.constant 0 : index
    %c0_120 = arith.constant 0 : index
    %c0_121 = arith.constant 0 : index
    %130 = vector.load %arg6[%c1_118, %c0_119, %c0_120, %c0_121] : memref<2x3x128x128xbf16, #tpu.memory_space<vmem>>, vector<1x1x128x128xbf16>
    %131 = vector.shape_cast %130 : vector<1x1x128x128xbf16> to vector<128x128xbf16>
    %cst_122 = arith.constant dense<0.000000e+00> : vector<16x128xf32>
    %132 = tpu.matmul %129, %131, %cst_122 {dimension_numbers = #tpu.dot_dimension_numbers<[1], [0], [0], [1], [0, 0, 1, 1], [], []>} : vector<16x128xbf16>, vector<128x128xbf16>, vector<16x128xf32> -> vector<16x128xf32>
    %133 = arith.addf %125, %132 : vector<16x128xf32>
    %c0_123 = arith.constant 0 : index
    %c6_124 = arith.constant 6 : index
    %c0_125 = arith.constant 0 : index
    %134 = vector.load %arg16[%c0_123, %c6_124, %c0_125] : memref<1x24x128xf32, #tpu.memory_space<vmem>>, vector<1x16x128xf32>
    %135 = vector.shape_cast %134 : vector<1x16x128xf32> to vector<16x128xf32>
    %136 = arith.truncf %135 : vector<16x128xf32> to vector<16x128xbf16>
    %c1_126 = arith.constant 1 : index
    %c1_127 = arith.constant 1 : index
    %c0_128 = arith.constant 0 : index
    %c0_129 = arith.constant 0 : index
    %137 = vector.load %arg6[%c1_126, %c1_127, %c0_128, %c0_129] : memref<2x3x128x128xbf16, #tpu.memory_space<vmem>>, vector<1x1x128x128xbf16>
    %138 = vector.shape_cast %137 : vector<1x1x128x128xbf16> to vector<128x128xbf16>
    %cst_130 = arith.constant dense<0.000000e+00> : vector<16x128xf32>
    %139 = tpu.matmul %136, %138, %cst_130 {dimension_numbers = #tpu.dot_dimension_numbers<[1], [0], [0], [1], [0, 0, 1, 1], [], []>} : vector<16x128xbf16>, vector<128x128xbf16>, vector<16x128xf32> -> vector<16x128xf32>
    %140 = arith.addf %133, %139 : vector<16x128xf32>
    %141 = vector.broadcast %120 : vector<1x128xf32> to vector<16x128xf32>
    %142 = arith.addf %140, %141 : vector<16x128xf32>
    %cst_131 = arith.constant 0.000000e+00 : f32
    %143 = vector.broadcast %cst_131 : f32 to vector<16x128xf32>
    %144 = arith.maximumf %142, %143 : vector<16x128xf32>
    %c1_132 = arith.constant 1 : index
    %c0_133 = arith.constant 0 : index
    %c0_134 = arith.constant 0 : index
    %145 = vector.load %arg11[%c1_132, %c0_133, %c0_134] : memref<2x1x128xf32, #tpu.memory_space<vmem>>, vector<1x1x128xf32>
    %146 = vector.shape_cast %145 : vector<1x1x128xf32> to vector<1x128xf32>
    %147 = vector.broadcast %146 : vector<1x128xf32> to vector<16x128xf32>
    %148 = arith.mulf %144, %147 : vector<16x128xf32>
    %c1_135 = arith.constant 1 : index
    %c0_136 = arith.constant 0 : index
    %c0_137 = arith.constant 0 : index
    %149 = vector.load %arg12[%c1_135, %c0_136, %c0_137] : memref<2x1x128xf32, #tpu.memory_space<vmem>>, vector<1x1x128xf32>
    %150 = vector.shape_cast %149 : vector<1x1x128xf32> to vector<1x128xf32>
    %151 = vector.broadcast %150 : vector<1x128xf32> to vector<16x128xf32>
    %152 = arith.addf %148, %151 : vector<16x128xf32>
    %153 = arith.addf %152, %83 : vector<16x128xf32>
    %cst_138 = arith.constant 0.000000e+00 : f32
    %154 = vector.broadcast %cst_138 : f32 to vector<16x128xf32>
    %155 = arith.maximumf %153, %154 : vector<16x128xf32>
    %156 = vector.shape_cast %155 : vector<16x128xf32> to vector<1x16x128xf32>
    %157 = vector.shape_cast %156 : vector<1x16x128xf32> to vector<16x128xf32>
    %158 = arith.truncf %157 : vector<16x128xf32> to vector<16x128xbf16>
    %c0_139 = arith.constant 0 : index
    %c0_140 = arith.constant 0 : index
    %159 = vector.load %arg13[%c0_139, %c0_140] : memref<128x128xbf16, #tpu.memory_space<vmem>>, vector<128x128xbf16>
    %cst_141 = arith.constant dense<0.000000e+00> : vector<16x128xf32>
    %160 = tpu.matmul %158, %159, %cst_141 {dimension_numbers = #tpu.dot_dimension_numbers<[1], [0], [0], [1], [0, 0, 1, 1], [], []>} : vector<16x128xbf16>, vector<128x128xbf16>, vector<16x128xf32> -> vector<16x128xf32>
    %c0_142 = arith.constant 0 : index
    %c0_143 = arith.constant 0 : index
    %161 = vector.load %arg14[%c0_142, %c0_143] : memref<1x128xf32, #tpu.memory_space<vmem>>, vector<1x128xf32>
    %162 = vector.broadcast %161 : vector<1x128xf32> to vector<16x128xf32>
    %163 = arith.addf %160, %162 : vector<16x128xf32>
    %164 = vector.shape_cast %163 : vector<16x128xf32> to vector<1x16x128xf32>
    %c0_144 = arith.constant 0 : index
    %c0_145 = arith.constant 0 : index
    %c0_146 = arith.constant 0 : index
    %165 = vector.load %arg15[%c0_144, %c0_145, %c0_146] : memref<1x16x128xf32, #tpu.memory_space<vmem>>, vector<1x16x128xf32>
    tpu.vector_store %arg15[%c0_144, %c0_145, %c0_146], %164 {strides = array<i32>} : memref<1x16x128xf32, #tpu.memory_space<vmem>>, vector<1x16x128xf32>,
    return
  }
  func.func @transform_0(%arg0: i32) -> (i32, i32, i32) {
    %c0_i32 = arith.constant 0 : i32
    %c0_i32_0 = arith.constant 0 : i32
    %c0_i32_1 = arith.constant 0 : i32
    return %arg0, %c0_i32, %c0_i32_0 : i32, i32, i32
  }
  func.func @transform_1(%arg0: i32) -> (i32, i32, i32) {
    %c0_i32 = arith.constant 0 : i32
    %c0_i32_0 = arith.constant 0 : i32
    %c0_i32_1 = arith.constant 0 : i32
    %c0_i32_2 = arith.constant 0 : i32
    return %c0_i32, %c0_i32_0, %c0_i32_1 : i32, i32, i32
  }
  func.func @transform_2(%arg0: i32) -> (i32, i32) {
    %c0_i32 = arith.constant 0 : i32
    %c0_i32_0 = arith.constant 0 : i32
    %c0_i32_1 = arith.constant 0 : i32
    return %c0_i32, %c0_i32_0 : i32, i32
  }
  func.func @transform_3(%arg0: i32) -> (i32, i32) {
    %c0_i32 = arith.constant 0 : i32
    %c0_i32_0 = arith.constant 0 : i32
    %c0_i32_1 = arith.constant 0 : i32
    return %c0_i32, %c0_i32_0 : i32, i32
  }
  func.func @transform_4(%arg0: i32) -> (i32, i32, i32, i32) {
    %c0_i32 = arith.constant 0 : i32
    %c0_i32_0 = arith.constant 0 : i32
    %c0_i32_1 = arith.constant 0 : i32
    %c0_i32_2 = arith.constant 0 : i32
    %c0_i32_3 = arith.constant 0 : i32
    return %c0_i32, %c0_i32_0, %c0_i32_1, %c0_i32_2 : i32, i32, i32, i32
  }
  func.func @transform_5(%arg0: i32) -> (i32, i32, i32, i32) {
    %c0_i32 = arith.constant 0 : i32
    %c0_i32_0 = arith.constant 0 : i32
    %c0_i32_1 = arith.constant 0 : i32
    %c0_i32_2 = arith.constant 0 : i32
    %c0_i32_3 = arith.constant 0 : i32
    return %c0_i32, %c0_i32_0, %c0_i32_1, %c0_i32_2 : i32, i32, i32, i32
  }
  func.func @transform_6(%arg0: i32) -> (i32, i32, i32) {
    %c0_i32 = arith.constant 0 : i32
    %c0_i32_0 = arith.constant 0 : i32
    %c0_i32_1 = arith.constant 0 : i32
    %c0_i32_2 = arith.constant 0 : i32
    return %c0_i32, %c0_i32_0, %c0_i32_1 : i32, i32, i32
  }
  func.func @transform_7(%arg0: i32) -> (i32, i32, i32) {
    %c0_i32 = arith.constant 0 : i32
    %c0_i32_0 = arith.constant 0 : i32
    %c0_i32_1 = arith.constant 0 : i32
    %c0_i32_2 = arith.constant 0 : i32
    return %c0_i32, %c0_i32_0, %c0_i32_1 : i32, i32, i32
  }
  func.func @transform_8(%arg0: i32) -> (i32, i32, i32) {
    %c0_i32 = arith.constant 0 : i32
    %c0_i32_0 = arith.constant 0 : i32
    %c0_i32_1 = arith.constant 0 : i32
    %c0_i32_2 = arith.constant 0 : i32
    return %c0_i32, %c0_i32_0, %c0_i32_1 : i32, i32, i32
  }
  func.func @transform_9(%arg0: i32) -> (i32, i32, i32) {
    %c0_i32 = arith.constant 0 : i32
    %c0_i32_0 = arith.constant 0 : i32
    %c0_i32_1 = arith.constant 0 : i32
    %c0_i32_2 = arith.constant 0 : i32
    return %c0_i32, %c0_i32_0, %c0_i32_1 : i32, i32, i32
  }
  func.func @transform_10(%arg0: i32) -> (i32, i32, i32) {
    %c0_i32 = arith.constant 0 : i32
    %c0_i32_0 = arith.constant 0 : i32
    %c0_i32_1 = arith.constant 0 : i32
    %c0_i32_2 = arith.constant 0 : i32
    return %c0_i32, %c0_i32_0, %c0_i32_1 : i32, i32, i32
  }
  func.func @transform_11(%arg0: i32) -> (i32, i32, i32) {
    %c0_i32 = arith.constant 0 : i32
    %c0_i32_0 = arith.constant 0 : i32
    %c0_i32_1 = arith.constant 0 : i32
    %c0_i32_2 = arith.constant 0 : i32
    return %c0_i32, %c0_i32_0, %c0_i32_1 : i32, i32, i32
  }
  func.func @transform_12(%arg0: i32) -> (i32, i32) {
    %c0_i32 = arith.constant 0 : i32
    %c0_i32_0 = arith.constant 0 : i32
    %c0_i32_1 = arith.constant 0 : i32
    return %c0_i32, %c0_i32_0 : i32, i32
  }
  func.func @transform_13(%arg0: i32) -> (i32, i32) {
    %c0_i32 = arith.constant 0 : i32
    %c0_i32_0 = arith.constant 0 : i32
    %c0_i32_1 = arith.constant 0 : i32
    return %c0_i32, %c0_i32_0 : i32, i32
  }
  func.func @transform_14(%arg0: i32) -> (i32, i32, i32) {
    %c0_i32 = arith.constant 0 : i32
    %c0_i32_0 = arith.constant 0 : i32
    %c0_i32_1 = arith.constant 0 : i32
    return %arg0, %c0_i32, %c0_i32_0 : i32, i32, i32
  }
}

</mosaic_0001>

<bundles_post_ra>
// kernel: tpu_custom_call.1
= control target key start
LH: loop header
LB: loop body
LE: loop exit
PB: predicated region body
PF: predicated region fallthrough
CT: control target
= control target key end

     0   :  { %s3456_s0 = inlined_call_operand.hbm [shape: f32[2,16,128], index: 0, kind: input, shape index: {}]   ;;  %s3457_s1 = inlined_call_operand.hbm [shape: bf16[3,128,128], index: 1, kind: input, shape index: {}]   ;;  %s3458_s2 = inlined_call_operand.hbm [shape: bf16[128,128], index: 2, kind: input, shape index: {}]   ;;  %s3459_s3 = inlined_call_operand.hbm [shape: f32[1,128], index: 3, kind: input, shape index: {}]   ;;  %s3460_s4 = inlined_call_operand.hbm [shape: bf16[1,3,128,128], index: 4, kind: input, shape index: {}]   ;;  %s3461_s5 = inlined_call_operand.hbm [shape: bf16[2,3,128,128], index: 5, kind: input, shape index: {}]   ;;  %s3462_s6 = inlined_call_operand.vmem [shape: f32[2,1,128], index: 6, kind: input, shape index: {}]   ;;  %s3463_s7 = inlined_call_operand.vmem [shape: f32[2,1,128], index: 7, kind: input, shape index: {}]   ;;  %s3464_s8 = inlined_call_operand.vmem [shape: f32[2,1,128], index: 8, kind: input, shape index: {}]   ;;  %s3465_s9 = inlined_call_operand.vmem [shape: f32[2,1,128], index: 9, kind: input, shape index: {}]   ;;  %s3466_s10 = inlined_call_operand.hbm [shape: f32[2,1,128], index: 10, kind: input, shape index: {}]   ;;  %s3467_s11 = inlined_call_operand.vmem [shape: f32[2,1,128], index: 11, kind: input, shape index: {}]   ;;  %s3468_s12 = inlined_call_operand.hbm [shape: bf16[128,128], index: 12, kind: input, shape index: {}]   ;;  %s3469_s13 = inlined_call_operand.vmem [shape: f32[1,128], index: 13, kind: input, shape index: {}]   ;;  %s3470_s14 = inlined_call_operand.hbm [shape: f32[2,16,128], index: 14, kind: output, shape index: {}]  }
   0x1   :  { %3472 = sst [smem:[#allocation24_spill]] %s3457_s1 }
   0x2   :  { %3473 = sst [smem:[#allocation25_spill]] %s3458_s2 }
   0x3   :  { %3474 = sst [smem:[#allocation26_spill]] %s3459_s3 }
   0x4   :  { %3475 = sst [smem:[#allocation27_spill]] %s3460_s4 }
   0x5   :  { %3476 = sst [smem:[#allocation28_spill]] %s3461_s5 }
   0x6   :  { %3477 = sst [smem:[#allocation29_spill]] %s3466_s10 }
   0x7   :  { %3478 = sst [smem:[#allocation30_spill]] %s3468_s12 }
   0x8   :  { %3479 = sst [smem:[#allocation31_spill]] %s3469_s13 }
   0x9   :  { %3480 = sst [smem:[#allocation32_spill]] %s3470_s14 }
   0xa   :  { %19 = vsyncpa [#allocation4], 0 }
   0xb   :  { %21 = vsyncpa [#allocation4 + $0x1], 0 }
   0xc   :  { %22 = vsyncpa [#allocation7], 0 }
   0xd   :  { %23 = vsyncpa [#allocation10], 0 }
   0xe   :  { %24 = vsyncpa [#allocation13], 0 }
   0xf   :  { %25 = vsyncpa [#allocation16], 0 }
  0x10   :  { %26 = vsyncpa [#allocation5], 0 }
  0x11   :  { %28 = vsyncpa [#allocation5 + $0x1], 0  ;;  %s3190_s29 = smov 0   ;;  %s3192_s30 = smov 0  }
  0x12   :  { %s3194_s15 = smov 0   ;;  %s3196_s16 = smov 0  }
  0x13 LB: > { %s3481_s1 = sld [smem:[#allocation24_spill]]  ;;  %s3214_s20 = sadd.s32 4294967295, %s3097_s16   ;;  %s3097_s16 = sphi %s3196_s16, %s3501_s16   ;;  %s3093_s15 = sphi %s3194_s15, %s3500_s15   ;;  %s3089_s30 = sphi %s3192_s30, %s3499_s30   ;;  %s3085_s29 = sphi %s3190_s29, %s3498_s29  }
  0x14   : > { %p2041_p0 = scmp.ge.s32.totalorder %s3097_s16, 1  ;;  %p55_p1 = scmp.eq.s32.totalorder %s3214_s20, 0 }
  0x15   : > { %p364_p2 = scmp.lt.s32.totalorder %s3097_s16, 3  ;;  %s3099_s22 = smov [#allocation6]  }
  0x16   : > { %s377_s23 = sshll.u32 %s3099_s22, 4  ;;  %s3483_s3 = sld [smem:[#allocation26_spill]]  ;;  %s378_s23 = int_to_ptr.vmem [resolvable:$true] %s377_s23 }
  0x17   : > { %p3219_p3 = pnand %p2041_p0, %p364_p2  ;;  %s3485_s5 = sld [smem:[#allocation28_spill]] }
  0x18   : > { %s3100_s22 = smov [#allocation9]   ;;  %s3101_s14 = smov 64  }
  0x19   : > { %s375_s19 = sshll.u32 %s3481_s1, 4  ;;  %p2667_p4 = pneg %p3219_p3  ;;  %s376_s19 = int_to_ptr.hbm [resolvable:$true] %s375_s19 }
  0x1a   : > { %s406_s1 = sshll.u32 %s3100_s22, 4  ;;  %s3102_s13 = smov 4   ;;  %s407_s1 = int_to_ptr.vmem [resolvable:$true] %s406_s1 }
  0x1b   : > { %p3231_p6 = pnand %p2667_p4, %p55_p1  ;;  %s3486_s2 = sld [smem:[#allocation25_spill]] }
  0x1c   : > { %s404_s26 = sshll.u32 %s3483_s3, 4  ;;  %s3103_s28 = smov [#allocation12]   ;;  %s405_s26 = int_to_ptr.hbm [resolvable:$true] %s404_s26 }
  0x1d   : > { %s429_s18 = sshll.u32 %s3485_s5, 4  ;;  %s431_s17 = sshll.u32 %s3103_s28, 4  ;;  %s430_s18 = int_to_ptr.hbm [resolvable:$true] %s429_s18  ;;  %s432_s17 = int_to_ptr.vmem [resolvable:$true] %s431_s17 }
  0x1e   : > { %2670 = dma.hbm_to_vmem [thread:$0]  (!%p3231_p6), %s376_s19, 3072, %s378_s23, [#allocation7], %s3101_s14, %s3101_s14, %s3102_s13  }
  0x1f   : > { %2676 = dma.hbm_to_vmem [thread:$0]  (!%p3231_p6), %s405_s26, 16, %s407_s1, [#allocation10]  }
  0x20   : > { %2682 = dma.hbm_to_vmem [thread:$0]  (!%p3231_p6), %s430_s18, 6144, %s432_s17, [#allocation13], %s3101_s14, %s3101_s14, %s3102_s13  }
  0x21   : > { %s389_s3 = sshll.u32 %s3486_s2, 4  ;;  %s3104_s22 = smov [#allocation8]   ;;  %s390_s3 = int_to_ptr.hbm [resolvable:$true] %s389_s3 }
  0x22   : > { %s391_s19 = sshll.u32 %s3104_s22, 4  ;;  %s3487_s4 = sld [smem:[#allocation27_spill]]  ;;  %s392_s19 = int_to_ptr.vmem [resolvable:$true] %s391_s19 }
  0x23   : > { %2673 = dma.hbm_to_vmem [thread:$0]  (!%p3231_p6), %s390_s3, 1024, %s392_s19, [#allocation7], %s3101_s14, %s3101_s14, %s3102_s13  }
  0x24   : > { %s3488_s10 = sld [smem:[#allocation29_spill]]  ;;  %s3105_s28 = smov [#allocation11]  }
  0x25   : > { %s417_s18 = sshll.u32 %s3105_s28, 4  ;;  %s3106_s5 = smov [#allocation14]   ;;  %s418_s18 = int_to_ptr.vmem [resolvable:$true] %s417_s18 }
  0x26   : > { %s457_s3 = sshll.u32 %s3106_s5, 4  ;;  %s3107_s17 = smov 16   ;;  %s458_s3 = int_to_ptr.vmem [resolvable:$true] %s457_s3 }
  0x27   : > { %s3108_s22 = smov 1   ;;  %s3489_s12 = sld [smem:[#allocation30_spill]] }
  0x28   : > { %s415_s1 = sshll.u32 %s3487_s4, 4  ;;  %s2040_s28 = sadd.s32 4294967294, %s3097_s16   ;;  %s416_s1 = int_to_ptr.hbm [resolvable:$true] %s415_s1 }
  0x29   : > { %2679 = dma.hbm_to_vmem [thread:$0]  (!%p3231_p6), %s416_s1, 3072, %s418_s18, [#allocation10], %s3101_s14, %s3101_s14, %s3102_s13  }
  0x2a   : > { %s455_s25 = sshll.u32 %s3488_s10, 4  ;;  %s3109_s1 = smov [#allocation15]   ;;  %s456_s25 = int_to_ptr.hbm [resolvable:$true] %s455_s25 }
  0x2b   : > { %2685 = dma.hbm_to_vmem [thread:$0]  (!%p3231_p6), %s456_s25, 32, %s458_s3, [#allocation13], %s3107_s17, %s3107_s17, %s3108_s22  }
  0x2c   : > { %s474_s24 = sshll.u32 %s3109_s1, 4  ;;  %s3281_s18 = sadd.s32 1, %s3097_s16   ;;  %s475_s24 = int_to_ptr.vmem [resolvable:$true] %s474_s24 }
  0x2d   : > { %s472_s26 = sshll.u32 %s3489_s12, 4  ;;  %s41_s25 = sadd.s32 1, %s3093_s15  ;;  %s473_s26 = int_to_ptr.hbm [resolvable:$true] %s472_s26 }
  0x2e   : > { %2688 = dma.hbm_to_vmem [thread:$0]  (!%p3231_p6), %s473_s26, 1024, %s475_s24, [#allocation16], %s3101_s14, %s3101_s14, %s3102_s13  }
  0x2f   : > { %s38_s5 = ssub.s32 %s3097_s16, %s3281_s18  ;;  %p48_p7 = scmp.ne.s32.totalorder %s3093_s15, %s3089_s30 }
  0x30   : > { %p39_p8 = scmp.eq.s32.totalorder %s38_s5, 0  ;;  %p49_p9 = scmp.eq.s32.totalorder %s3097_s16, 0 }
  0x31   : > { %p54_p10 = scmp.ne.s32.totalorder %s3089_s30, %s3085_s29  ;;  %p351_p11 = scmp.eq.s32.totalorder %s3214_s20, 1 }
  0x32   : > { %s3293_s3 = scalar_select %p39_p8, %s3093_s15, %s41_s25  }
  0x33   : > { %p3295_p12 = por %p49_p9, %p48_p7  ;;  %p3301_p13 = por %p55_p1, %p54_p10 }
  0x34   : > { %p3305_p0 = por %p351_p11, %p48_p7  ;;  %p357_p2 = scmp.eq.s32.totalorder %s2040_s28, 1 }
  0x35   : > { %p2704_p4 = scmp.lt.s32.totalorder %s3097_s16, 2  ;;  %s491_s17 = sand.u32 1, %s3093_s15  }
  0x36   : > { %p3311_p6 = por %p357_p2, %p54_p10  ;;  %s2050_s19 = sshll.u32 %s491_s17, 4 }
  0x37   : > { %s2521_s23 = sshll.u32 %s3097_s16, 4  ;;  %s495_s5 = scalar_lea.vmem [#allocation3], %s2050_s19 }
  0x38   : > { %s500_s24 = scalar_lea.hbm %s3456_s0, %s2521_s23  ;;  %s503_s2 = sshll.u32 %s495_s5, 4  ;;  %s504_s2 = int_to_ptr.vmem [resolvable:$true] %s503_s2 }
  0x39   : > { %s501_s25 = sshll.u32 %s500_s24, 4  ;;  %p3321_p7 = pnand %p2704_p4, %p3295_p12  ;;  %s502_s25 = int_to_ptr.hbm [resolvable:$true] %s501_s25 }
  0x3a   : > { %s492_s4 = scalar_lea.sflag [#allocation4], %s491_s17  ;;  %s2985_s10 = sshra.s32 %s502_s25, 4  ;;  %s2986_s10 = int_to_ptr.hbm [resolvable:$true] %s2985_s10 }
  0x3b   : > { %s2987_s12 = scalar_lea.hbm %s2986_s10, 16  ;;  %p2989_p9 = pneg %p3321_p7 }
  0x3c   : > { %p2988_p8 = scmp.ne.s32.totalorder %s2986_s10, %s2987_s12  ;;  %s2992_s26 = scalar_lea.hbm %s3456_s0, 32 }
  0x3d   : > { %p2993_p12 = scmp.lt.s32.totalorder %s2986_s10, %s3456_s0  ;;  %p2994_p2 = scmp.lt.s32.totalorder %s2992_s26, %s2987_s12 }
  0x3e   : > { %p2990_p10 = pnand %p2989_p9, %p2988_p8 }
  0x3f   : > { %p2995_p4 = por %p2994_p2, %p2993_p12 }
  0x40   : > { %p2991_p11 = pneg %p2990_p10 }
  0x42   : > { %p2996_p5 = pnand %p2995_p4, %p2991_p11 }
  0x44   : > { %2999 = shalt.err (!%p2996_p5)
}
  0x45   : > { %s3110_s17 = smov 128   ;;  %s3111_s24 = smov 8  }
  0x46   : > { %2692 = dma.hbm_to_vmem [thread:$0]  (!%p3321_p7), %s502_s25, 256, %s504_s2, %s492_s4, %s3110_s17, %s3110_s17, %s3111_s24  }
  0x47   : > { %515 = sbr.rel (%p3219_p3) target bundleno = 905 (0x389), region = 76  ;;  %s3338_s5 = sand.u32 (!%p3219_p3), 1, %s3089_s30  }
  0x48   : > { %s2054_s10 = sshll.u32 (!%p3219_p3), %s3338_s5, 4  ;;  %s518_s12 = scalar_lea.sflag (!%p3219_p3), [#allocation4], %s3338_s5 }
  0x49   : > { %s521_s23 = scalar_lea.vmem (!%p3219_p3), [#allocation3], %s2054_s10 }
  0x4c   : > { %3060 = dma.done.wait (%p3301_p13), %s518_s12, 256  }
  0x4d   : > { %3062 = vsyncadd (%p3301_p13), %s518_s12, 4294967040 }
  0x4e   : > { %3064 = dma.done.wait (%p55_p1), [#allocation7], 4096  }
  0x4f   : > { %3066 = vsyncadd (%p55_p1), [#allocation7], 4294963200 }
  0x50   : > { %3068 = dma.done.wait (%p55_p1), [#allocation10], 3088  }
  0x51   : > { %3070 = vsyncadd (%p55_p1), [#allocation10], 4294964208 }
  0x52   : > { %3072 = dma.done.wait (%p55_p1), [#allocation13], 6176  }
  0x53   : > { %3074 = vsyncadd (%p55_p1), [#allocation13], 4294961120 }
  0x54   : > { %3076 = dma.done.wait (%p55_p1), [#allocation16], 1024  }
  0x55   : > { %3078 = vsyncadd (%p55_p1), [#allocation16], 4294966272  ;;  %v3112_v0 = vmov 0.0   ;;  %v2545_v1 = vld [vmem:[#allocation6 + $0x38] sm:$0xff]  ;;  %v2544_v4 = vld [vmem:[#allocation6 + $0x30] sm:$0xff]  ;;  %s3495_s1 = sld [smem:[#allocation31_spill]] }
  0x56   : > { %602 = vst [vmem:[#allocation2] sm:$0xff] %v3112_v0  ;;  %v2537_v2 = vld [vmem:[#allocation6 + $0xb8] sm:$0xff]  ;;  %777 = vmatpush.bf16.msra.mxu1 %v2545_v1  ;;  %v2536_v5 = vld [vmem:[#allocation6 + $0xb0] sm:$0xff]  ;;  %v2543_v7 = vld [vmem:[#allocation6 + $0x28] sm:$0xff]  ;;  %s2634_s27 = sshll.u32 %s3214_s20, 4  ;;  %s3496_s12 = sld [smem:[#allocation32_spill]] }
  0x57   : > { %v2553_v3 = vld [vmem:[#allocation6 + $0x78] sm:$0xff]  ;;  %845 = vmatpush.bf16.msra.mxu2 %v2537_v2  ;;  %v2552_v6 = vld [vmem:[#allocation6 + $0x70] sm:$0xff]  ;;  %v2535_v8 = vld [vmem:[#allocation6 + $0xa8] sm:$0xff]  ;;  %s601_s2 = scalar_lea.vmem [#allocation17], %s2054_s10  ;;  %s1885_s13 = scalar_lea.sflag [#allocation5], %s3338_s5 }
  0x58   : > { %927 = vmatpush.bf16.msra.mxu3 %v2553_v3  ;;  %v2551_v9 = vld [vmem:[#allocation6 + $0x68] sm:$0xff]  ;;  %v3364_v10 = vld [vmem:[%s521_s23] sm:$0xff]  ;;  %v2529_v12 = vld [vmem:[#allocation8 + $0x38] sm:$0xff]  ;;  %s1897_s4 = sshll.u32 %s601_s2, 4  ;;  %s1898_s4 = int_to_ptr.vmem [resolvable:$true] %s1897_s4 }
  0x59   : > { %v3366_v11 = vld [vmem:[%s521_s23 + $0x8] sm:$0xff]  ;;  %v2542_v13 = vld [vmem:[#allocation6 + $0x20] sm:$0xff]  ;;  %708 = vst [vmem:[#allocation2 + $0x8] sm:$0xff] %v3364_v10  ;;  %v2528_v16 = vld [vmem:[#allocation8 + $0x30] sm:$0xff]  ;;  %674 = vmatpush.bf16.msra.mxu0 %v2529_v12  ;;  %v689_v25 = vpack.c.bf16 %v3364_v10, %v3364_v10 }
  0x5a   : > { %778 = vmatpush.bf16.msra.mxu1 %v2544_v4  ;;  %v2534_v14 = vld [vmem:[#allocation6 + $0xa0] sm:$0xff]  ;;  %709 = vst [vmem:[#allocation2 + $0x10] sm:$0xff] %v3366_v11  ;;  %v2541_v17 = vld [vmem:[#allocation6 + $0x18] sm:$0xff]  ;;  %v2527_v20 = vld [vmem:[#allocation8 + $0x28] sm:$0xff]  ;;  %v690_v26 = vpack.c.bf16 %v3366_v11, %v3366_v11  ;;  %v605_v56 = vpack.c.bf16 %v3366_v11, %v3364_v10 }
  0x5b   : > { %846 = vmatpush.bf16.msra.mxu2 %v2536_v5  ;;  %v2550_v15 = vld [vmem:[#allocation6 + $0x60] sm:$0xff]  ;;  %v2533_v18 = vld [vmem:[#allocation6 + $0x98] sm:$0xff]  ;;  %v2540_v21 = vld [vmem:[#allocation6 + $0x10] sm:$0xff]  ;;  %v793_v33 = vunpack.c.l.b16 %v689_v25 }
  0x5c   : > { %928 = vmatpush.bf16.msra.mxu3 %v2552_v6  ;;  %v2549_v19 = vld [vmem:[#allocation6 + $0x58] sm:$0xff]  ;;  %v2532_v22 = vld [vmem:[#allocation6 + $0x90] sm:$0xff]  ;;  %v2526_v24 = vld [vmem:[#allocation8 + $0x20] sm:$0xff]  ;;  %v794_v34 = vunpack.c.l.b16 %v690_v26  ;;  %s1896_s23 = scalar_lea.hbm %s3496_s12, %s2634_s27  ;;  %s3035_s10 = scalar_lea.hbm %s3496_s12, 32 }
  0x5d   : > { %675 = vmatpush.bf16.msra.mxu0 %v2528_v16  ;;  %v2548_v23 = vld [vmem:[#allocation6 + $0x50] sm:$0xff]  ;;  %v2539_v27 = vld [vmem:[#allocation6 + $0x8] sm:$0xff]  ;;  %v2525_v30 = vld [vmem:[#allocation8 + $0x18] sm:$0xff]  ;;  %s1899_s21 = sshll.u32 %s1896_s23, 4  ;;  %s1900_s21 = int_to_ptr.hbm [resolvable:$true] %s1899_s21 }
  0x5e   : > { %779 = vmatpush.bf16.msra.mxu1 %v2543_v7  ;;  %v2531_v28 = vld [vmem:[#allocation6 + $0x88] sm:$0xff]  ;;  %v2538_v31 = vld [vmem:[#allocation6] sm:$0xff]  ;;  %v2524_v40 = vld [vmem:[#allocation8 + $0x10] sm:$0xff]  ;;  %v795_v42 = vpack.c.b16 %v794_v34, %v793_v33  ;;  %s3029_s25 = sshra.s32 %s1900_s21, 4  ;;  %s3030_s25 = int_to_ptr.hbm [resolvable:$true] %s3029_s25 }
  0x5f   : > { %847 = vmatpush.bf16.msra.mxu2 %v2535_v8  ;;  %v2547_v29 = vld [vmem:[#allocation6 + $0x48] sm:$0xff]  ;;  %v2530_v32 = vld [vmem:[#allocation6 + $0x80] sm:$0xff]  ;;  %v2560_v48 = vld [vmem:[#allocation12 + $0xb0] sm:$0xff]  ;;  %s3031_s20 = scalar_lea.hbm %s3030_s25, 16  ;;  %p3036_p13 = scmp.lt.s32.totalorder %s3030_s25, %s3496_s12 }
  0x60   : > { %929 = vmatpush.bf16.msra.mxu3 %v2551_v9  ;;  %v2546_v35 = vld [vmem:[#allocation6 + $0x40] sm:$0xff]  ;;  %v710_v36 = vld [vmem:[#allocation2 + $0x6] sm:$0xff]  ;;  %v2761_v11 = vld [vmem:[%s3462_s6] ss:$0 sm:$0xff]  ;;  %p3032_p1 = scmp.ne.s32.totalorder %s3030_s25, %s3031_s20  ;;  %p3037_p7 = scmp.lt.s32.totalorder %s3035_s10, %s3031_s20 }
  0x61   : > { %676 = vmatpush.bf16.msra.mxu0 %v2527_v20  ;;  %v711_v37 = vld [vmem:[#allocation2 + $0xe] sm:$0xff]  ;;  %v2523_v44 = vld [vmem:[#allocation8 + $0x8] sm:$0xff]  ;;  %v2522_v46 = vld [vmem:[#allocation8] sm:$0xff] }
  0x62   : > { %780 = vmatpush.bf16.msra.mxu1 %v2542_v13  ;;  %v859_v38 = vld [vmem:[#allocation2 + $0x7] sm:$0xff]  ;;  %v860_v39 = vld [vmem:[#allocation2 + $0xf] sm:$0xff]  ;;  %v712_v41 = vpack.c.bf16 %v711_v37, %v710_v36  ;;  %v2558_v54 = vld [vmem:[#allocation12 + $0xa0] sm:$0xff]  ;;  %p3033_p3 = pnand %p3032_p1, %p3305_p0  ;;  %p3038_p8 = por %p3037_p7, %p3036_p13 }
  0x63   : > { %848 = vmatpush.bf16.msra.mxu2 %v2534_v14  ;;  %v861_v43 = vpack.c.bf16 %v860_v39, %v859_v38  ;;  %v2561_v45 = vld [vmem:[#allocation12 + $0xb8] sm:$0xff]  ;;  %v2568_v50 = vld [vmem:[#allocation12 + $0x30] sm:$0xff]  ;;  %v2559_v51 = vld [vmem:[#allocation12 + $0xa8] sm:$0xff] }
  0x64   : > { %930 = vmatpush.bf16.msra.mxu3 %v2550_v15  ;;  %v2569_v47 = vld [vmem:[#allocation12 + $0x38] sm:$0xff]  ;;  %v2576_v52 = vld [vmem:[#allocation12 + $0x70] sm:$0xff]  ;;  %v2567_v53 = vld [vmem:[#allocation12 + $0x28] sm:$0xff]  ;;  %p3034_p5 = pneg %p3033_p3 }
  0x65   : > { %677 = vmatpush.bf16.msra.mxu0 %v2526_v24  ;;  %v2577_v49 = vld [vmem:[#allocation12 + $0x78] sm:$0xff]  ;;  %v2575_v55 = vld [vmem:[#allocation12 + $0x68] sm:$0xff]  ;;  %v2566_v57 = vld [vmem:[#allocation12 + $0x20] sm:$0xff] }
  0x66   : > { %781 = vmatpush.bf16.msra.mxu1 %v2541_v17  ;;  %v2557_v58 = vld [vmem:[#allocation12 + $0x98] sm:$0xff]  ;;  %v2574_v59 = vld [vmem:[#allocation12 + $0x60] sm:$0xff]  ;;  %v2556_v61 = vld [vmem:[#allocation12 + $0x90] sm:$0xff]  ;;  %p3039_p9 = pnand %p3038_p8, %p3034_p5 }
  0x67   : > { %849 = vmatpush.bf16.msra.mxu2 %v2533_v18  ;;  %v2565_v60 = vld [vmem:[#allocation12 + $0x18] sm:$0xff]  ;;  %v2564_v63 = vld [vmem:[#allocation12 + $0x10] sm:$0xff]  ;;  %v2555_v0 = vld [vmem:[#allocation12 + $0x88] sm:$0xff] }
  0x68   : > { %931 = vmatpush.bf16.msra.mxu3 %v2549_v19  ;;  %v2573_v62 = vld [vmem:[#allocation12 + $0x58] sm:$0xff]  ;;  %v2572_v1 = vld [vmem:[#allocation12 + $0x50] sm:$0xff]  ;;  %v2563_v2 = vld [vmem:[#allocation12 + $0x8] sm:$0xff] }
  0x69   : > { %678 = vmatpush.bf16.msra.mxu0 %v2525_v30  ;;  %v2554_v3 = vld [vmem:[#allocation12 + $0x80] sm:$0xff]  ;;  %v2571_v4 = vld [vmem:[#allocation12 + $0x48] sm:$0xff]  ;;  %v2585_v39 = vld [vmem:[#allocation11 + $0xb8] sm:$0xff] }
  0x6a   : > { %782 = vmatpush.bf16.msra.mxu1 %v2540_v21  ;;  %v2562_v5 = vld [vmem:[#allocation12] sm:$0xff] }
  0x6b   : > { %850 = vmatpush.bf16.msra.mxu2 %v2532_v22  ;;  %v2570_v6 = vld [vmem:[#allocation12 + $0x40] sm:$0xff] }
  0x6c   : > { %932 = vmatpush.bf16.msra.mxu3 %v2548_v23  ;;  %v2762_v14 = vld [vmem:[%s3463_s7] ss:$0 sm:$0xff] }
  0x6d   : > { %679 = vmatpush.bf16.msra.mxu0 %v2524_v40  ;;  %v2763_v16 = vld [vmem:[%s3464_s8] ss:$0 sm:$0xff]  ;;  %v2593_v40 = vld [vmem:[#allocation11 + $0x38] sm:$0xff] }
  0x6e   : > { %783 = vmatpush.bf16.msra.mxu1 %v2539_v27 }
  0x6f   : > { %851 = vmatpush.bf16.msra.mxu2 %v2531_v28 }
  0x70   : > { %933 = vmatpush.bf16.msra.mxu3 %v2547_v29 }
  0x71   : > { %680 = vmatpush.bf16.msra.mxu0 %v2523_v44  ;;  %v2583_v44 = vld [vmem:[#allocation11 + $0xa8] sm:$0xff] }
  0x72   : > { %784 = vmatpush.bf16.msra.mxu1 %v2538_v31 }
  0x73   : > { %852 = vmatpush.bf16.msra.mxu2 %v2530_v32 }
  0x74   : > { %934 = vmatpush.bf16.msra.mxu3 %v2546_v35 }
  0x75   : > { %785 = vmatmul.bf16.vlgmr.msra.gmra.mxu1 %v712_v41  ;;  %681 = vmatpush.bf16.msra.mxu0 %v2522_v46  ;;  %v2584_v41 = vld [vmem:[#allocation11 + $0xb0] sm:$0xff] }
  0x76   : > { %853 = vmatmul.bf16.vlgmr.msra.gmra.mxu2 %v795_v42  ;;  %1119 = vmatpush.bf16.msrb.mxu1 %v2561_v45  ;;  %v2601_v42 = vld [vmem:[#allocation11 + $0x78] sm:$0xff]  ;;  %v2600_v45 = vld [vmem:[#allocation11 + $0x70] sm:$0xff] }
  0x77   : > { %935 = vmatmul.bf16.vlgmr.msra.gmra.mxu3 %v861_v43  ;;  %1201 = vmatpush.bf16.msrb.mxu2 %v2577_v49  ;;  %v2592_v43 = vld [vmem:[#allocation11 + $0x30] sm:$0xff]  ;;  %v2599_v49 = vld [vmem:[#allocation11 + $0x68] sm:$0xff] }
  0x78   : > { %682 = vmatmul.bf16.vlgmr.msra.gmra.mxu0 %v605_v56  ;;  %1330 = vmatpush.bf16.msrb.mxu3 %v2593_v40  ;;  %v2609_v40 = vld [vmem:[#allocation12 + $0x178] sm:$0xff] }
  0x79   : > { %1051 = vmatpush.bf16.msrb.mxu0 %v2569_v47  ;;  %v2591_v47 = vld [vmem:[#allocation11 + $0x28] sm:$0xff] }
  0x7a   : > { %1120 = vmatpush.bf16.msrb.mxu1 %v2560_v48  ;;  %v2582_v48 = vld [vmem:[#allocation11 + $0xa0] sm:$0xff] }
  0x7b   : > { %1202 = vmatpush.bf16.msrb.mxu2 %v2576_v52  ;;  %v2598_v52 = vld [vmem:[#allocation11 + $0x60] sm:$0xff] }
  0x7c   : > { %1331 = vmatpush.bf16.msrb.mxu3 %v2592_v43  ;;  %v2625_v43 = vld [vmem:[#allocation12 + $0x138] sm:$0xff] }
  0x7d   : > { %1052 = vmatpush.bf16.msrb.mxu0 %v2568_v50  ;;  %v2590_v50 = vld [vmem:[#allocation11 + $0x20] sm:$0xff] }
  0x7e   : > { %1121 = vmatpush.bf16.msrb.mxu1 %v2559_v51  ;;  %v2581_v51 = vld [vmem:[#allocation11 + $0x98] sm:$0xff] }
  0x7f   : > { %1203 = vmatpush.bf16.msrb.mxu2 %v2575_v55  ;;  %v2597_v55 = vld [vmem:[#allocation11 + $0x58] sm:$0xff] }
  0x80   : > { %1332 = vmatpush.bf16.msrb.mxu3 %v2591_v47  ;;  %v2615_v47 = vld [vmem:[#allocation12 + $0xe8] sm:$0xff] }
  0x81   : > { %1053 = vmatpush.bf16.msrb.mxu0 %v2567_v53  ;;  %v2589_v53 = vld [vmem:[#allocation11 + $0x18] sm:$0xff] }
  0x82   : > { %1122 = vmatpush.bf16.msrb.mxu1 %v2558_v54  ;;  %v2580_v54 = vld [vmem:[#allocation11 + $0x90] sm:$0xff] }
  0x83   : > { %1204 = vmatpush.bf16.msrb.mxu2 %v2574_v59  ;;  %v2596_v59 = vld [vmem:[#allocation11 + $0x50] sm:$0xff] }
  0x84   : > { %1333 = vmatpush.bf16.msrb.mxu3 %v2590_v50  ;;  %v2614_v50 = vld [vmem:[#allocation12 + $0xe0] sm:$0xff] }
  0x85   : > { %1054 = vmatpush.bf16.msrb.mxu0 %v2566_v57  ;;  %v2588_v57 = vld [vmem:[#allocation11 + $0x10] sm:$0xff] }
  0x86   : > { %1123 = vmatpush.bf16.msrb.mxu1 %v2557_v58  ;;  %v2579_v58 = vld [vmem:[#allocation11 + $0x88] sm:$0xff] }
  0x87   : > { %1205 = vmatpush.bf16.msrb.mxu2 %v2573_v62  ;;  %v2595_v62 = vld [vmem:[#allocation11 + $0x48] sm:$0xff] }
  0x88   : > { %1334 = vmatpush.bf16.msrb.mxu3 %v2589_v53  ;;  %v2613_v53 = vld [vmem:[#allocation12 + $0xd8] sm:$0xff] }
  0x89   : > { %1055 = vmatpush.bf16.msrb.mxu0 %v2565_v60  ;;  %v2587_v60 = vld [vmem:[#allocation11 + $0x8] sm:$0xff] }
  0x8a   : > { %1124 = vmatpush.bf16.msrb.mxu1 %v2556_v61  ;;  %v2578_v61 = vld [vmem:[#allocation11 + $0x80] sm:$0xff] }
  0x8b   : > { %1206 = vmatpush.bf16.msrb.mxu2 %v2572_v1  ;;  %v2586_v1 = vld [vmem:[#allocation11] sm:$0xff] }
  0x8c   : > { %1335 = vmatpush.bf16.msrb.mxu3 %v2588_v57  ;;  %v2603_v57 = vld [vmem:[#allocation12 + $0x148] sm:$0xff] }
  0x8d   : > { %1056 = vmatpush.bf16.msrb.mxu0 %v2564_v63 }
  0x8e   : > { %1125 = vmatpush.bf16.msrb.mxu1 %v2555_v0 }
  0x8f   : > { %1207 = vmatpush.bf16.msrb.mxu2 %v2571_v4  ;;  %v2765_v4 = vld [vmem:[%s3465_s9] ss:$0 sm:$0xff] }
  0x90   : > { %1336 = vmatpush.bf16.msrb.mxu3 %v2587_v60  ;;  %v2602_v60 = vld [vmem:[#allocation12 + $0x140] sm:$0xff] }
  0x91   : > { %1057 = vmatpush.bf16.msrb.mxu0 %v2563_v2  ;;  %v2594_v2 = vld [vmem:[#allocation11 + $0x40] sm:$0xff] }
  0x92   : > { %1126 = vmatpush.bf16.msrb.mxu1 %v2554_v3 }
  0x93   : > { %1208 = vmatpush.bf16.msrb.mxu2 %v2570_v6 }
  0x94   : > { %1337 = vmatpush.bf16.msrb.mxu3 %v2586_v1 }
  0x95   : > { %1058 = vmatpush.bf16.msrb.mxu0 %v2562_v5 }
  0x96   : > { %1480 = vmatpush.bf16.msra.mxu1 %v2601_v42  ;;  %v2608_v42 = vld [vmem:[#allocation12 + $0x170] sm:$0xff] }
  0x98   : > { %1676 = vmatpush.bf16.msra.mxu3 %v2609_v40  ;;  %v2627_v40 = vld [vmem:[#allocation15 + $0x8] sm:$0xff] }
  0x99   : > { %1398 = vmatpush.bf16.msra.mxu0 %v2585_v39 }
  0x9a   : > { %1481 = vmatpush.bf16.msra.mxu1 %v2600_v45  ;;  %v2607_v45 = vld [vmem:[#allocation12 + $0x168] sm:$0xff] }
  0x9c   : > { %1677 = vmatpush.bf16.msra.mxu3 %v2608_v42 }
  0x9d   : > { %1399 = vmatpush.bf16.msra.mxu0 %v2584_v41  ;;  %v2617_v41 = vld [vmem:[#allocation12 + $0xf8] sm:$0xff] }
  0x9e   : > { %1482 = vmatpush.bf16.msra.mxu1 %v2599_v49  ;;  %1608 = vmatpush.bf16.msra.mxu2 %v2617_v41  ;;  %v2623_v49 = vld [vmem:[#allocation12 + $0x128] sm:$0xff] }
  0x9f   : > { %v2626_v41 = vld [vmem:[#allocation15] sm:$0xff] }
  0xa0   : > { %1678 = vmatpush.bf16.msra.mxu3 %v2607_v45 }
  0xa1   : > { %1400 = vmatpush.bf16.msra.mxu0 %v2583_v44  ;;  %v2616_v44 = vld [vmem:[#allocation12 + $0xf0] sm:$0xff] }
  0xa2   : > { %1483 = vmatpush.bf16.msra.mxu1 %v2598_v52  ;;  %1609 = vmatpush.bf16.msra.mxu2 %v2616_v44  ;;  %v2622_v52 = vld [vmem:[#allocation12 + $0x120] sm:$0xff] }
  0xa5   : > { %1401 = vmatpush.bf16.msra.mxu0 %v2582_v48  ;;  %v2606_v48 = vld [vmem:[#allocation12 + $0x160] sm:$0xff] }
  0xa6   : > { %1484 = vmatpush.bf16.msra.mxu1 %v2597_v55  ;;  %1610 = vmatpush.bf16.msra.mxu2 %v2615_v47  ;;  %v2621_v55 = vld [vmem:[#allocation12 + $0x118] sm:$0xff] }
  0xa7   : > { %1679 = vmatpush.bf16.msra.mxu3 %v2606_v48 }
  0xa9   : > { %1402 = vmatpush.bf16.msra.mxu0 %v2581_v51  ;;  %v2605_v51 = vld [vmem:[#allocation12 + $0x158] sm:$0xff] }
  0xaa   : > { %1485 = vmatpush.bf16.msra.mxu1 %v2596_v59  ;;  %1611 = vmatpush.bf16.msra.mxu2 %v2614_v50  ;;  %v2611_v59 = vld [vmem:[#allocation12 + $0xc8] sm:$0xff]  ;;  %v2772_v50 = vld [vmem:[#allocation14 + $0x1] ss:$0 sm:$0xff] }
  0xab   : > { %1680 = vmatpush.bf16.msra.mxu3 %v2605_v51 }
  0xad   : > { %1403 = vmatpush.bf16.msra.mxu0 %v2580_v54  ;;  %v2604_v54 = vld [vmem:[#allocation12 + $0x150] sm:$0xff] }
  0xae   : > { %1486 = vmatpush.bf16.msra.mxu1 %v2595_v62  ;;  %1612 = vmatpush.bf16.msra.mxu2 %v2613_v53  ;;  %v2610_v62 = vld [vmem:[#allocation12 + $0xc0] sm:$0xff] }
  0xaf   : > { %1681 = vmatpush.bf16.msra.mxu3 %v2604_v54 }
  0xb1   : > { %1404 = vmatpush.bf16.msra.mxu0 %v2579_v58  ;;  %v2620_v58 = vld [vmem:[#allocation12 + $0x110] sm:$0xff] }
  0xb2   : > { %1487 = vmatpush.bf16.msra.mxu1 %v2594_v2 }
  0xb3   : > { %1682 = vmatpush.bf16.msra.mxu3 %v2603_v57 }
  0xb5   : > { %1405 = vmatpush.bf16.msra.mxu0 %v2578_v61  ;;  %v2619_v61 = vld [vmem:[#allocation12 + $0x108] sm:$0xff] }
  0xb7   : > { %1683 = vmatpush.bf16.msra.mxu3 %v2602_v60 }
  0xf2   : > { %v786_v7 = vpop.f32.mrf.mxu1 }
  0xf5   : > { %v683_v46 = vpop.f32.mrf.mxu0 }
  0xf9   : > { %v854_v8 = vpop.f32.mrf.mxu2 }
  0xfa   : > { %v855_v9 = vadd.f32 %v854_v8, %v786_v7  ;;  %v936_v10 = vpop.f32.mrf.mxu3  ;;  %v788_v17 = vpop.f32.mrf.mxu1  ;;  %v2766_v8 = vld [vmem:[#allocation14] ss:$0 sm:$0xff] }
  0xfc   : > { %v941_v12 = vadd.f32 %v936_v10, %v855_v9  ;;  %v2764_v10 = vld [vmem:[#allocation9] ss:$0 sm:$0xff] }
  0xfd   : > { %v685_v56 = vpop.f32.mrf.mxu0 }
  0xfe   : > { %v946_v13 = vadd.f32 %v2761_v11, %v941_v12  ;;  %v2767_v12 = vld [vmem:[%s3467_s11] ss:$0 sm:$0xff] }
 0x100   : > { %v948_v15 = vmax.f32 %v946_v13, 0.0 }
 0x101   : > { %v856_v18 = vpop.f32.mrf.mxu2 }
 0x102   : > { %v954_v19 = vmul.f32 %v2762_v14, %v948_v15  ;;  %v857_v20 = vadd.f32 %v856_v18, %v788_v17  ;;  %v938_v21 = vpop.f32.mrf.mxu3  ;;  %v684_v17 = vadd.f32 %v2764_v10, %v683_v46  ;;  %v2624_v46 = vld [vmem:[#allocation12 + $0x130] sm:$0xff] }
 0x104   : > { %v960_v22 = vadd.f32 %v2763_v16, %v954_v19  ;;  %v942_v23 = vadd.f32 %v938_v21, %v857_v20 }
 0x106   : > { %982 = vst [vmem:[#allocation2 + $0x8] sm:$0xff] %v960_v22  ;;  %v947_v24 = vadd.f32 %v2761_v11, %v942_v23  ;;  %v963_v28 = vpack.c.bf16 %v960_v22, %v960_v22 }
 0x108   : > { %v949_v25 = vmax.f32 %v947_v24, 0.0  ;;  %v1067_v30 = vunpack.c.l.b16 %v963_v28 }
 0x10a   : > { %v955_v26 = vmul.f32 %v2762_v14, %v949_v25  ;;  %v686_v25 = vadd.f32 %v2764_v10, %v685_v56  ;;  %v2612_v56 = vld [vmem:[#allocation12 + $0xd0] sm:$0xff] }
 0x10b   : > { %1613 = vmatpush.bf16.msra.mxu2 %v2612_v56  ;;  %v2773_v56 = vld [vmem:[%s3467_s11 + $0x1] ss:$0 sm:$0xff] }
 0x10c   : > { %v961_v27 = vadd.f32 %v2763_v16, %v955_v26 }
 0x10d   : > { %v984_v33 = vld [vmem:[#allocation2 + $0x6] sm:$0xff] }
 0x10e   : > { %983 = vst [vmem:[#allocation2 + $0x10] sm:$0xff] %v961_v27  ;;  %v964_v29 = vpack.c.bf16 %v961_v27, %v961_v27  ;;  %v1133_v35 = vld [vmem:[#allocation2 + $0x7] sm:$0xff] }
 0x10f   : > { %1614 = vmatpush.bf16.msra.mxu2 %v2611_v59 }
 0x110   : > { %v1068_v31 = vunpack.c.l.b16 %v964_v29 }
 0x112   : > { %v1069_v32 = vpack.c.b16 %v1068_v31, %v1067_v30 }
 0x113   : > { %1615 = vmatpush.bf16.msra.mxu2 %v2610_v62 }
 0x114   : > { %1127 = vmatmul.bf16.vlgmr.msrb.gmra.mxu1 %v1069_v32 }
 0x115   : > { %v985_v34 = vld [vmem:[#allocation2 + $0xe] sm:$0xff] }
 0x116   : > { %v1134_v36 = vld [vmem:[#allocation2 + $0xf] sm:$0xff]  ;;  %v986_v37 = vpack.c.bf16 %v985_v34, %v984_v33 }
 0x117   : > { %v1135_v38 = vpack.c.bf16 %v1134_v36, %v1133_v35 }
 0x118   : > { %1059 = vmatmul.bf16.vlgmr.msrb.gmra.mxu0 %v986_v37 }
 0x119   : > { %1209 = vmatmul.bf16.vlgmr.msrb.gmra.mxu2 %v1135_v38  ;;  %1758 = vmatpush.bf16.msrb.mxu0 %v2625_v43 }
 0x11d   : > { %1759 = vmatpush.bf16.msrb.mxu0 %v2624_v46  ;;  %v2771_v46 = vld [vmem:[%s3465_s9 + $0x1] ss:$0 sm:$0xff] }
 0x121   : > { %1760 = vmatpush.bf16.msrb.mxu0 %v2623_v49 }
 0x125   : > { %1761 = vmatpush.bf16.msrb.mxu0 %v2622_v52 }
 0x129   : > { %1762 = vmatpush.bf16.msrb.mxu0 %v2621_v55 }
 0x12d   : > { %1763 = vmatpush.bf16.msrb.mxu0 %v2620_v58 }
 0x131   : > { %1764 = vmatpush.bf16.msrb.mxu0 %v2619_v61 }
 0x191   : > { %v1128_v0 = vpop.f32.mrf.mxu1 }
 0x195   : > { %v1060_v63 = vpop.f32.mrf.mxu0 }
 0x196   : > { %v1129_v3 = vadd.f32 %v1128_v0, %v1060_v63  ;;  %v2618_v63 = vld [vmem:[#allocation12 + $0x100] sm:$0xff] }
 0x197   : > { %1765 = vmatpush.bf16.msrb.mxu0 %v2618_v63 }
 0x199   : > { %v1130_v13 = vpop.f32.mrf.mxu1 }
 0x19c   : > { %v1210_v5 = vpop.f32.mrf.mxu2 }
 0x19d   : > { %v1215_v6 = vadd.f32 %v1210_v5, %v1129_v3  ;;  %v1062_v9 = vpop.f32.mrf.mxu0 }
 0x19e   : > { %v1131_v15 = vadd.f32 %v1130_v13, %v1062_v9  ;;  %v2770_v9 = vld [vmem:[%s3464_s8 + $0x1] ss:$0 sm:$0xff] }
 0x19f   : > { %v1220_v7 = vadd.f32 %v2765_v4, %v1215_v6 }
 0x1a1   : > { %v1222_v11 = vmax.f32 %v1220_v7, 0.0  ;;  %v2769_v7 = vld [vmem:[%s3463_s7 + $0x1] ss:$0 sm:$0xff] }
 0x1a3   : > { %v1228_v14 = vmul.f32 %v2766_v8, %v1222_v11 }
 0x1a4   : > { %v1212_v16 = vpop.f32.mrf.mxu2 }
 0x1a5   : > { %v1234_v18 = vadd.f32 %v2767_v12, %v1228_v14  ;;  %v1216_v19 = vadd.f32 %v1212_v16, %v1131_v15 }
 0x1a7   : > { %v1236_v20 = vadd.f32 %v1234_v18, %v684_v17  ;;  %v1221_v21 = vadd.f32 %v2765_v4, %v1216_v19  ;;  %v2768_v4 = vld [vmem:[%s3462_s6 + $0x1] ss:$0 sm:$0xff] }
 0x1a9   : > { %v3391_v22 = vmax.f32 %v1236_v20, 0.0  ;;  %v1223_v23 = vmax.f32 %v1221_v21, 0.0 }
 0x1ab   : > { %1261 = vst [vmem:[#allocation2 + $0x8] sm:$0xff] %v3391_v22  ;;  %v1229_v24 = vmul.f32 %v2766_v8, %v1223_v23  ;;  %v1242_v29 = vpack.c.bf16 %v3391_v22, %v3391_v22 }
 0x1ad   : > { %v1235_v26 = vadd.f32 %v2767_v12, %v1229_v24  ;;  %v1346_v31 = vunpack.c.l.b16 %v1242_v29 }
 0x1af   : > { %v1237_v27 = vadd.f32 %v1235_v26, %v686_v25 }
 0x1b1   : > { %v3394_v28 = vmax.f32 %v1237_v27, 0.0 }
 0x1b2   : > { %v1263_v34 = vld [vmem:[#allocation2 + $0x4] sm:$0xff] }
 0x1b3   : > { %1262 = vst [vmem:[#allocation2 + $0x10] sm:$0xff] %v3394_v28  ;;  %v1243_v30 = vpack.c.bf16 %v3394_v28, %v3394_v28  ;;  %v1412_v36 = vld [vmem:[#allocation2 + $0x6] sm:$0xff] }
 0x1b5   : > { %v1347_v32 = vunpack.c.l.b16 %v1243_v30 }
 0x1b7   : > { %v1348_v33 = vpack.c.b16 %v1347_v32, %v1346_v31 }
 0x1b9   : > { %1406 = vmatmul.bf16.vlgmr.msra.gmra.mxu0 %v1348_v33 }
 0x1ba   : > { %v1264_v35 = vld [vmem:[#allocation2 + $0xc] sm:$0xff] }
 0x1bb   : > { %v1413_v37 = vld [vmem:[#allocation2 + $0xe] sm:$0xff]  ;;  %v1265_v38 = vpack.c.bf16 %v1264_v35, %v1263_v34 }
 0x1bc   : > { %v1414_v39 = vpack.c.bf16 %v1413_v37, %v1412_v36  ;;  %v2633_v34 = vld [vmem:[#allocation15 + $0x38] sm:$0xff]  ;;  %v2632_v35 = vld [vmem:[#allocation15 + $0x30] sm:$0xff]  ;;  %v2631_v36 = vld [vmem:[#allocation15 + $0x28] sm:$0xff] }
 0x1bd   : > { %1338 = vmatmul.bf16.vlgmr.msrb.gmra.mxu3 %v1265_v38  ;;  %1868 = vmatpush.bf16.msrb.mxu1 %v2633_v34  ;;  %v2630_v37 = vld [vmem:[#allocation15 + $0x20] sm:$0xff]  ;;  %v2629_v38 = vld [vmem:[#allocation15 + $0x18] sm:$0xff] }
 0x1be   : > { %1488 = vmatmul.bf16.vlgmr.msra.gmra.mxu1 %v1414_v39  ;;  %v2628_v39 = vld [vmem:[#allocation15 + $0x10] sm:$0xff] }
 0x1c1   : > { %1869 = vmatpush.bf16.msrb.mxu1 %v2632_v35 }
 0x1c5   : > { %1870 = vmatpush.bf16.msrb.mxu1 %v2631_v36 }
 0x1c9   : > { %1871 = vmatpush.bf16.msrb.mxu1 %v2630_v37 }
 0x1cd   : > { %1872 = vmatpush.bf16.msrb.mxu1 %v2629_v38 }
 0x1d1   : > { %1873 = vmatpush.bf16.msrb.mxu1 %v2628_v39 }
 0x1d5   : > { %1874 = vmatpush.bf16.msrb.mxu1 %v2627_v40 }
 0x1d9   : > { %1875 = vmatpush.bf16.msrb.mxu1 %v2626_v41 }
 0x236   : > { %v1407_v0 = vpop.f32.mrf.mxu0 }
 0x23b   : > { %v1489_v1 = vpop.f32.mrf.mxu1 }
 0x23e   : > { %v1409_v10 = vpop.f32.mrf.mxu0 }
 0x240   : > { %v1339_v2 = vpop.f32.mrf.mxu3 }
 0x241   : > { %v1408_v3 = vadd.f32 %v1407_v0, %v1339_v2 }
 0x243   : > { %v1494_v5 = vadd.f32 %v1489_v1, %v1408_v3  ;;  %v1491_v14 = vpop.f32.mrf.mxu1 }
 0x245   : > { %v1499_v6 = vadd.f32 %v2768_v4, %v1494_v5 }
 0x247   : > { %v1501_v8 = vmax.f32 %v1499_v6, 0.0 }
 0x248   : > { %v1341_v11 = vpop.f32.mrf.mxu3 }
 0x249   : > { %v1508_v12 = vmul.f32 %v2769_v7, %v1501_v8  ;;  %v1410_v13 = vadd.f32 %v1409_v10, %v1341_v11 }
 0x24b   : > { %v1515_v15 = vadd.f32 %v2770_v9, %v1508_v12  ;;  %v1495_v16 = vadd.f32 %v1491_v14, %v1410_v13 }
 0x24d   : > { %1538 = vst [vmem:[#allocation2 + $0x8] sm:$0xff] %v1515_v15  ;;  %v1500_v17 = vadd.f32 %v2768_v4, %v1495_v16  ;;  %v1519_v21 = vpack.c.bf16 %v1515_v15, %v1515_v15  ;;  %v2774_v4 = vld [vmem:[%s3495_s1] ss:$0 sm:$0xff] }
 0x24f   : > { %v1502_v18 = vmax.f32 %v1500_v17, 0.0  ;;  %v1624_v24 = vunpack.c.l.b16 %v1519_v21 }
 0x251   : > { %v1509_v19 = vmul.f32 %v2769_v7, %v1502_v18 }
 0x253   : > { %v1516_v20 = vadd.f32 %v2770_v9, %v1509_v19 }
 0x254   : > { %v1540_v27 = vld [vmem:[#allocation2 + $0x4] sm:$0xff] }
 0x255   : > { %1539 = vst [vmem:[#allocation2 + $0x10] sm:$0xff] %v1516_v20  ;;  %v1520_v23 = vpack.c.bf16 %v1516_v20, %v1516_v20  ;;  %v1690_v30 = vld [vmem:[#allocation2 + $0x6] sm:$0xff] }
 0x257   : > { %v1625_v25 = vunpack.c.l.b16 %v1520_v23 }
 0x259   : > { %v1626_v26 = vpack.c.b16 %v1625_v25, %v1624_v24 }
 0x25b   : > { %1684 = vmatmul.bf16.vlgmr.msra.gmra.mxu3 %v1626_v26 }
 0x25c   : > { %v1541_v29 = vld [vmem:[#allocation2 + $0xc] sm:$0xff] }
 0x25d   : > { %v1691_v31 = vld [vmem:[#allocation2 + $0xe] sm:$0xff]  ;;  %v1542_v32 = vpack.c.bf16 %v1541_v29, %v1540_v27 }
 0x25e   : > { %v1692_v33 = vpack.c.bf16 %v1691_v31, %v1690_v30 }
 0x25f   : > { %1616 = vmatmul.bf16.vlgmr.msra.gmra.mxu2 %v1542_v32 }
 0x260   : > { %1766 = vmatmul.bf16.vlgmr.msrb.gmra.mxu0 %v1692_v33 }
 0x2dd   : > { %v1767_v43 = vpop.f32.mrf.mxu0 }
 0x2de   : > { %v1685_v42 = vpop.f32.mrf.mxu3 }
 0x2e2   : > { %v1617_v44 = vpop.f32.mrf.mxu2 }
 0x2e3   : > { %v1686_v45 = vadd.f32 %v1685_v42, %v1617_v44 }
 0x2e5   : > { %v1772_v47 = vadd.f32 %v1767_v43, %v1686_v45  ;;  %v1769_v54 = vpop.f32.mrf.mxu0 }
 0x2e6   : > { %v1687_v51 = vpop.f32.mrf.mxu3 }
 0x2e7   : > { %v1777_v48 = vadd.f32 %v2771_v46, %v1772_v47 }
 0x2e9   : > { %v1779_v49 = vmax.f32 %v1777_v48, 0.0 }
 0x2ea   : > { %v1619_v52 = vpop.f32.mrf.mxu2 }
 0x2eb   : > { %v1688_v53 = vadd.f32 %v1687_v51, %v1619_v52  ;;  %v1786_v55 = vmul.f32 %v2772_v50, %v1779_v49 }
 0x2ed   : > { %v1773_v57 = vadd.f32 %v1769_v54, %v1688_v53  ;;  %v1793_v59 = vadd.f32 %v2773_v56, %v1786_v55 }
 0x2ef   : > { %v1778_v58 = vadd.f32 %v2771_v46, %v1773_v57  ;;  %v1795_v63 = vadd.f32 %v1793_v59, %v3391_v22 }
 0x2f1   : > { %v1780_v60 = vmax.f32 %v1778_v58, 0.0  ;;  %v1797_v1 = vmax.f32 %v1795_v63, 0.0 }
 0x2f3   : > { %v1787_v61 = vmul.f32 %v2772_v50, %v1780_v60 }
 0x2f5   : > { %v1794_v62 = vadd.f32 %v2773_v56, %v1787_v61 }
 0x2f7   : > { %v1796_v0 = vadd.f32 %v1794_v62, %v3394_v28 }
 0x2f9   : > { %v1798_v2 = vmax.f32 %v1796_v0, 0.0 }
 0x2fb   : > { %v1799_v3 = vpack.c.bf16 %v1798_v2, %v1797_v1 }
 0x2fd   : > { %1876 = vmatmul.bf16.vlgmr.msrb.gmra.mxu1 %v1799_v3 }
 0x37a   : > { %v1877_v5 = vpop.f32.mrf.mxu1 }
 0x37b   : > { %v1878_v6 = vadd.f32 %v2774_v4, %v1877_v5 }
 0x37d   : > { %1882 = vst [vmem:[%s601_s2] sm:$0xff] %v1878_v6 }
 0x382   : > { %v1879_v22 = vpop.f32.mrf.mxu1 }
 0x383   : > { %v1880_v28 = vadd.f32 %v2774_v4, %v1879_v22 }
 0x385   : > { %1883 = vst [vmem:[%s601_s2 + $0x8] sm:$0xff] %v1880_v28 }
 0x386   : > { %3042 = shalt.err (!%p3039_p9)
}
 0x387   : > { %s3113_s5 = smov 128   ;;  %s3114_s27 = smov 8  }
 0x388   : > { %2665 = dma.vmem_to_hbm [thread:$0]  (%p3305_p0), %s1898_s4, 256, %s1900_s21, %s1885_s13, %s3113_s5, %s3113_s5, %s3114_s27  }
 0x389 PF: > { %s1914_s17 = sand.u32 1, %s3085_s29   ;;  %p3497_p10 = scmp.ge.s32.totalorder %s3097_s16, 2 }
 0x38a   : > { %s1915_s24 = scalar_lea.sflag [#allocation5], %s1914_s17 }
 0x38b   : > { %p2694_p11 = pnand %p3497_p10, %p3311_p6 }
 0x38d   : > { %p2695_p12 = pneg %p2694_p11 }
 0x38f   : > { %3080 = dma.done.wait (%p2695_p12), %s1915_s24, 256  }
 0x390   : > { %3082 = vsyncadd (%p2695_p12), %s1915_s24, 4294967040  ;;  %p31_p2 = scmp.ge.s32.totalorder %s3281_s18, 4   ;;  %s3498_s29 = smov %s3089_s30 }
 0x391   : > { %s3499_s30 = smov %s3093_s15  ;;  %s3500_s15 = smov %s3293_s3 }
 0x392   : > { %s3501_s16 = smov %s3281_s18  ;;  %33 = sbr.rel (!%p31_p2) target bundleno = 19 (0x13), region = 164 }
 0x397   :  { %1921 = vsyncpa [#allocation4], 1 }
 0x398   :  { %1923 = vsyncpa [#allocation4 + $0x1], 1 }
 0x399   :  { %1924 = vsyncpa [#allocation7], 1 }
 0x39a   :  { %1925 = vsyncpa [#allocation10], 1 }
 0x39b   :  { %1926 = vsyncpa [#allocation13], 1 }
 0x39c   :  { %1927 = vsyncpa [#allocation16], 1 }
 0x39d   :  { %1928 = vsyncpa [#allocation5], 1 }
 0x39e   :  { %1930 = vsyncpa [#allocation5 + $0x1], 1 }

</bundles_post_ra>
